<compile_context>
chip_gen: v7x
topology: tpu7x:2x2x1
jax: 0.10.0
libtpu: 0.0.40
codegen_flags: <defaults>
</compile_context>

<pallas_src>
import functools

import jax
import jax.numpy as jnp
from jax.experimental import pallas as pl
from jax.experimental.pallas import tpu as pltpu

_NEG_SLOPE = 0.2  # python float -> inlined literal (never a captured jax constant)


def _leaky_relu(x):
    return jnp.where(x > 0, x, _NEG_SLOPE * x)


def _elu(x):
    return jnp.where(x > 0, x, jnp.exp(jnp.minimum(x, 0.0)) - 1.0)


def gat_fused_kernel(x_ref, adj_ref, w1_ref, att1_ref, b1_ref,
                     w2_ref, att2_ref, b2_ref, out_ref, *, heads1, c1):
    adj = adj_ref[...]                                    # [N, N] f32 0/1 (edge j -> i)

    # ---------------- layer 1: GATConv(F_in -> C1, heads=H1, concat=True) ----------------
    xp = jnp.dot(x_ref[...], w1_ref[...],
                 preferred_element_type=jnp.float32)      # bf16 x bf16 -> f32 [N, H1*C1]
    xp_bf = xp.astype(jnp.bfloat16)

    # dst & src attention logits for every head in ONE matmul:
    # att1 = [blockdiag(att_dst) | blockdiag(att_src)]  ->  sc[:, :H] dst, sc[:, H:] src
    sc = jnp.dot(xp_bf, att1_ref[...],
                 preferred_element_type=jnp.float32)      # [N, 2*H1]
    a_dst = sc[:, :heads1]                                # [N, H1]  column per head
    a_srcT = sc[:, heads1:].T                             # [H1, N]  row per head

    outs = []
    for h in range(heads1):                               # static unroll, H1 small
        e = _leaky_relu(a_dst[:, h:h + 1] + a_srcT[h:h + 1, :])       # [N, N]
        m = jnp.max(e, axis=-1, keepdims=True)            # unmasked rowmax >= masked max
        p = adj * jnp.exp(e - m)                          # multiplicative edge mask
        s = jnp.sum(p, axis=-1, keepdims=True)            # [N, 1]
        agg = jnp.dot(p.astype(jnp.bfloat16), xp_bf[:, h * c1:(h + 1) * c1],
                      preferred_element_type=jnp.float32)  # [N, C1] on the MXU
        outs.append(agg * pl.reciprocal(s, approx=True))
    hfeat = _elu(jnp.concatenate(outs, axis=-1) + b1_ref[...])        # [N, H1*C1]

    # ---------------- layer 2: GATConv(H1*C1 -> C2, heads=1, concat=False) ----------------
    # Layer-2 params are zero-padded on the output-channel axis to 128 lanes;
    # padded lanes stay exactly zero through the whole layer.
    yp = jnp.dot(hfeat.astype(jnp.bfloat16), w2_ref[...],
                 preferred_element_type=jnp.float32)      # [N, C2p]
    yp_bf = yp.astype(jnp.bfloat16)
    sc2 = jnp.dot(yp_bf, att2_ref[...],
                  preferred_element_type=jnp.float32)     # [N, 2] (dst | src)
    e2 = _leaky_relu(sc2[:, 0:1] + sc2[:, 1:2].T)         # [N, N]
    m2 = jnp.max(e2, axis=-1, keepdims=True)
    p2 = adj * jnp.exp(e2 - m2)
    s2 = jnp.sum(p2, axis=-1, keepdims=True)              # [N, 1]
    acc2 = jnp.dot(p2.astype(jnp.bfloat16), yp_bf,
                   preferred_element_type=jnp.float32)    # [N, C2p]
    out = acc2 * pl.reciprocal(s2, approx=True) + b2_ref[...]
    # heads=1 & concat=False: mean over a single head is the identity.
    out_ref[...] = out.astype(out_ref.dtype)


def _block_diag_att(att):
    """[H, C] per-head attention vectors -> block-diagonal [H*C, H] matrix."""
    h, c = att.shape
    eye = jnp.eye(h, dtype=att.dtype)
    return (att[:, :, None] * eye[:, None, :]).reshape(h * c, h)


def gat_forward(x, adj, params):
    n = x.shape[0]
    att_src1, att_dst1 = params["att_src1"], params["att_dst1"]
    heads1, c1 = att_src1.shape                           # static shapes (safe under jit)
    w1, b1 = params["w1"], params["bias1"]
    w2, b2 = params["w2"], params["bias2"]
    att_src2, att_dst2 = params["att_src2"], params["att_dst2"]
    c2 = w2.shape[1]

    # Lane-dense output: pad layer-2 output channels up to a multiple of 128.
    c2_pad = ((c2 + 127) // 128) * 128
    pad = c2_pad - c2

    # Fused attention-vector operands: [dst | src] block-diagonal, bf16.
    att1 = jnp.concatenate([_block_diag_att(att_dst1), _block_diag_att(att_src1)],
                           axis=1).astype(jnp.bfloat16)                  # [H1*C1, 2*H1]
    att2 = jnp.pad(jnp.concatenate([_block_diag_att(att_dst2),
                                    _block_diag_att(att_src2)], axis=1),
                   ((0, pad), (0, 0))).astype(jnp.bfloat16)              # [C2p, 2]

    w1_bf = w1.astype(jnp.bfloat16)
    w2_p = jnp.pad(w2, ((0, 0), (0, pad))).astype(jnp.bfloat16)          # [H1*C1, C2p]
    b2_p = jnp.pad(b2, ((0, 0), (0, pad)))                               # [1, C2p]
    x_bf = x.astype(jnp.bfloat16)

    kernel = functools.partial(gat_fused_kernel, heads1=heads1, c1=c1)
    out_padded = pl.pallas_call(
        kernel,
        out_shape=jax.ShapeDtypeStruct((n, c2_pad), jnp.float32),
        in_specs=[pl.BlockSpec(memory_space=pltpu.MemorySpace.VMEM)] * 8,
        out_specs=pl.BlockSpec(memory_space=pltpu.MemorySpace.VMEM),
    )(x_bf, adj, w1_bf, att1, b1, w2_p, att2, b2_p)
    return out_padded[:, :c2]


def _glorot(key, shape):
    fan_in, fan_out = shape[0], shape[-1]
    limit = (6.0 / (fan_in + fan_out)) ** 0.5
    return jax.random.uniform(key, shape, jnp.float32, -limit, limit)


if __name__ == "__main__":
    key = jax.random.PRNGKey(0)
    keys = jax.random.split(key, 12)

    # Small synthetic graph / dims consistent with the module's forward.
    N, E = 64, 128
    input_dim, hidden_dim, output_dim = 16, 8, 8
    heads1 = 4

    x = jax.random.normal(keys[0], (N, input_dim), jnp.float32)
    src = jax.random.randint(keys[1], (E,), 0, N)
    dst = jax.random.randint(keys[2], (E,), 0, N)
    edge_index = jnp.stack([src, dst])  # [2, E]: row 0 = source, row 1 = target

    # Dense adjacency mask adj[i, j] = 1 iff edge j -> i, plus self-loops
    # (PyG GATConv add_self_loops=True).
    adj = jnp.zeros((N, N), jnp.float32).at[edge_index[1], edge_index[0]].set(1.0)
    adj = adj.at[jnp.arange(N), jnp.arange(N)].set(1.0)

    params = {
        # conv1: in=input_dim, out=hidden_dim, heads=4, concat=True
        "w1": _glorot(keys[3], (input_dim, heads1 * hidden_dim)),
        "att_src1": _glorot(keys[4], (heads1, hidden_dim)),
        "att_dst1": _glorot(keys[5], (heads1, hidden_dim)),
        "bias1": jnp.zeros((1, heads1 * hidden_dim), jnp.float32),
        # conv2: in=4*hidden_dim, out=output_dim, heads=1, concat=False
        "w2": _glorot(keys[6], (heads1 * hidden_dim, output_dim)),
        "att_src2": _glorot(keys[7], (1, output_dim)),
        "att_dst2": _glorot(keys[8], (1, output_dim)),
        "bias2": jnp.zeros((1, output_dim), jnp.float32),
    }

    out = jax.jit(gat_forward)(x, adj, params)
    jax.block_until_ready(out)
    assert out.shape == (N, output_dim) and out.dtype == jnp.float32
    assert bool(jnp.all(jnp.isfinite(out)))
    print("KERNEL_OK")
</pallas_src>

<mosaic_0001>
module attributes {stable_mosaic.version = 11 : i64} {
  func.func @gat_fused_kernel(%arg0: memref<64x16xbf16, #tpu.memory_space<vmem>>, %arg1: memref<64x64xf32, #tpu.memory_space<vmem>>, %arg2: memref<16x32xbf16, #tpu.memory_space<vmem>>, %arg3: memref<32x8xbf16, #tpu.memory_space<vmem>>, %arg4: memref<1x32xf32, #tpu.memory_space<vmem>>, %arg5: memref<32x128xbf16, #tpu.memory_space<vmem>>, %arg6: memref<128x2xbf16, #tpu.memory_space<vmem>>, %arg7: memref<1x128xf32, #tpu.memory_space<vmem>>, %arg8: memref<64x128xf32, #tpu.memory_space<vmem>>) attributes {dimension_semantics = [], scalar_prefetch = 0 : i64, scratch_operands = 0 : i64, tpu.core_type = #tpu.core_type<tc>} {
    %c0 = arith.constant 0 : index
    %c0_0 = arith.constant 0 : index
    %0 = vector.load %arg1[%c0, %c0_0] : memref<64x64xf32, #tpu.memory_space<vmem>>, vector<64x64xf32>
    %c0_1 = arith.constant 0 : index
    %c0_2 = arith.constant 0 : index
    %1 = vector.load %arg0[%c0_1, %c0_2] : memref<64x16xbf16, #tpu.memory_space<vmem>>, vector<64x16xbf16>
    %c0_3 = arith.constant 0 : index
    %c0_4 = arith.constant 0 : index
    %2 = vector.load %arg2[%c0_3, %c0_4] : memref<16x32xbf16, #tpu.memory_space<vmem>>, vector<16x32xbf16>
    %cst = arith.constant dense<0.000000e+00> : vector<64x32xf32>
    %3 = tpu.matmul %1, %2, %cst {dimension_numbers = #tpu.dot_dimension_numbers<[1], [0], [0], [1], [0, 0, 1, 1], [], []>} : vector<64x16xbf16>, vector<16x32xbf16>, vector<64x32xf32> -> vector<64x32xf32>
    %4 = arith.truncf %3 : vector<64x32xf32> to vector<64x32xbf16>
    %c0_5 = arith.constant 0 : index
    %c0_6 = arith.constant 0 : index
    %5 = vector.load %arg3[%c0_5, %c0_6] : memref<32x8xbf16, #tpu.memory_space<vmem>>, vector<32x8xbf16>
    %cst_7 = arith.constant dense<0.000000e+00> : vector<64x8xf32>
    %6 = tpu.matmul %4, %5, %cst_7 {dimension_numbers = #tpu.dot_dimension_numbers<[1], [0], [0], [1], [0, 0, 1, 1], [], []>} : vector<64x32xbf16>, vector<32x8xbf16>, vector<64x8xf32> -> vector<64x8xf32>
    %7 = vector.extract_strided_slice %6 {offsets = [0, 0], sizes = [64, 4], strides = [1, 1]} : vector<64x8xf32> to vector<64x4xf32>
    %8 = vector.extract_strided_slice %6 {offsets = [0, 4], sizes = [64, 4], strides = [1, 1]} : vector<64x8xf32> to vector<64x4xf32>
    %9 = tpu.transpose %8, [1, 0] : vector<64x4xf32> -> vector<4x64xf32>
    %10 = vector.extract_strided_slice %7 {offsets = [0, 0], sizes = [64, 1], strides = [1, 1]} : vector<64x4xf32> to vector<64x1xf32>
    %11 = vector.extract_strided_slice %9 {offsets = [0, 0], sizes = [1, 64], strides = [1, 1]} : vector<4x64xf32> to vector<1x64xf32>
    %12 = vector.broadcast %10 : vector<64x1xf32> to vector<64x64xf32>
    %13 = vector.broadcast %11 : vector<1x64xf32> to vector<64x64xf32>
    %14 = arith.addf %12, %13 : vector<64x64xf32>
    %cst_8 = arith.constant 0.000000e+00 : f32
    %15 = vector.broadcast %cst_8 : f32 to vector<64x64xf32>
    %16 = arith.cmpf ogt, %14, %15 : vector<64x64xf32>
    %cst_9 = arith.constant 2.000000e-01 : f32
    %17 = vector.broadcast %cst_9 : f32 to vector<64x64xf32>
    %18 = arith.mulf %17, %14 : vector<64x64xf32>
    %19 = arith.select %16, %14, %18 : vector<64x64xi1>, vector<64x64xf32>
    %cst_10 = arith.constant dense<0xFF800000> : vector<64xf32>
    %20 = vector.multi_reduction <maximumf>, %19, %cst_10 [1] : vector<64x64xf32> to vector<64xf32>
    %21 = vector.shape_cast %20 : vector<64xf32> to vector<64x1xf32>
    %22 = vector.broadcast %21 : vector<64x1xf32> to vector<64x64xf32>
    %23 = arith.subf %19, %22 : vector<64x64xf32>
    %24 = math.exp %23 : vector<64x64xf32>
    %25 = arith.mulf %0, %24 : vector<64x64xf32>
    %cst_11 = arith.constant dense<0.000000e+00> : vector<64xf32>
    %26 = vector.multi_reduction <add>, %25, %cst_11 [1] : vector<64x64xf32> to vector<64xf32>
    %27 = vector.shape_cast %26 : vector<64xf32> to vector<64x1xf32>
    %28 = arith.truncf %25 : vector<64x64xf32> to vector<64x64xbf16>
    %29 = vector.extract_strided_slice %4 {offsets = [0, 0], sizes = [64, 8], strides = [1, 1]} : vector<64x32xbf16> to vector<64x8xbf16>
    %cst_12 = arith.constant dense<0.000000e+00> : vector<64x8xf32>
    %30 = tpu.matmul %28, %29, %cst_12 {dimension_numbers = #tpu.dot_dimension_numbers<[1], [0], [0], [1], [0, 0, 1, 1], [], []>} : vector<64x64xbf16>, vector<64x8xbf16>, vector<64x8xf32> -> vector<64x8xf32>
    %31 = tpu.reciprocal %27 {approx = true} : vector<64x1xf32> -> vector<64x1xf32>
    %32 = vector.broadcast %31 : vector<64x1xf32> to vector<64x8xf32>
    %33 = arith.mulf %30, %32 : vector<64x8xf32>
    %34 = vector.extract_strided_slice %7 {offsets = [0, 1], sizes = [64, 1], strides = [1, 1]} : vector<64x4xf32> to vector<64x1xf32>
    %35 = vector.extract_strided_slice %9 {offsets = [1, 0], sizes = [1, 64], strides = [1, 1]} : vector<4x64xf32> to vector<1x64xf32>
    %36 = vector.broadcast %34 : vector<64x1xf32> to vector<64x64xf32>
    %37 = vector.broadcast %35 : vector<1x64xf32> to vector<64x64xf32>
    %38 = arith.addf %36, %37 : vector<64x64xf32>
    %cst_13 = arith.constant 0.000000e+00 : f32
    %39 = vector.broadcast %cst_13 : f32 to vector<64x64xf32>
    %40 = arith.cmpf ogt, %38, %39 : vector<64x64xf32>
    %cst_14 = arith.constant 2.000000e-01 : f32
    %41 = vector.broadcast %cst_14 : f32 to vector<64x64xf32>
    %42 = arith.mulf %41, %38 : vector<64x64xf32>
    %43 = arith.select %40, %38, %42 : vector<64x64xi1>, vector<64x64xf32>
    %cst_15 = arith.constant dense<0xFF800000> : vector<64xf32>
    %44 = vector.multi_reduction <maximumf>, %43, %cst_15 [1] : vector<64x64xf32> to vector<64xf32>
    %45 = vector.shape_cast %44 : vector<64xf32> to vector<64x1xf32>
    %46 = vector.broadcast %45 : vector<64x1xf32> to vector<64x64xf32>
    %47 = arith.subf %43, %46 : vector<64x64xf32>
    %48 = math.exp %47 : vector<64x64xf32>
    %49 = arith.mulf %0, %48 : vector<64x64xf32>
    %cst_16 = arith.constant dense<0.000000e+00> : vector<64xf32>
    %50 = vector.multi_reduction <add>, %49, %cst_16 [1] : vector<64x64xf32> to vector<64xf32>
    %51 = vector.shape_cast %50 : vector<64xf32> to vector<64x1xf32>
    %52 = arith.truncf %49 : vector<64x64xf32> to vector<64x64xbf16>
    %53 = vector.extract_strided_slice %4 {offsets = [0, 8], sizes = [64, 8], strides = [1, 1]} : vector<64x32xbf16> to vector<64x8xbf16>
    %cst_17 = arith.constant dense<0.000000e+00> : vector<64x8xf32>
    %54 = tpu.matmul %52, %53, %cst_17 {dimension_numbers = #tpu.dot_dimension_numbers<[1], [0], [0], [1], [0, 0, 1, 1], [], []>} : vector<64x64xbf16>, vector<64x8xbf16>, vector<64x8xf32> -> vector<64x8xf32>
    %55 = tpu.reciprocal %51 {approx = true} : vector<64x1xf32> -> vector<64x1xf32>
    %56 = vector.broadcast %55 : vector<64x1xf32> to vector<64x8xf32>
    %57 = arith.mulf %54, %56 : vector<64x8xf32>
    %58 = vector.extract_strided_slice %7 {offsets = [0, 2], sizes = [64, 1], strides = [1, 1]} : vector<64x4xf32> to vector<64x1xf32>
    %59 = vector.extract_strided_slice %9 {offsets = [2, 0], sizes = [1, 64], strides = [1, 1]} : vector<4x64xf32> to vector<1x64xf32>
    %60 = vector.broadcast %58 : vector<64x1xf32> to vector<64x64xf32>
    %61 = vector.broadcast %59 : vector<1x64xf32> to vector<64x64xf32>
    %62 = arith.addf %60, %61 : vector<64x64xf32>
    %cst_18 = arith.constant 0.000000e+00 : f32
    %63 = vector.broadcast %cst_18 : f32 to vector<64x64xf32>
    %64 = arith.cmpf ogt, %62, %63 : vector<64x64xf32>
    %cst_19 = arith.constant 2.000000e-01 : f32
    %65 = vector.broadcast %cst_19 : f32 to vector<64x64xf32>
    %66 = arith.mulf %65, %62 : vector<64x64xf32>
    %67 = arith.select %64, %62, %66 : vector<64x64xi1>, vector<64x64xf32>
    %cst_20 = arith.constant dense<0xFF800000> : vector<64xf32>
    %68 = vector.multi_reduction <maximumf>, %67, %cst_20 [1] : vector<64x64xf32> to vector<64xf32>
    %69 = vector.shape_cast %68 : vector<64xf32> to vector<64x1xf32>
    %70 = vector.broadcast %69 : vector<64x1xf32> to vector<64x64xf32>
    %71 = arith.subf %67, %70 : vector<64x64xf32>
    %72 = math.exp %71 : vector<64x64xf32>
    %73 = arith.mulf %0, %72 : vector<64x64xf32>
    %cst_21 = arith.constant dense<0.000000e+00> : vector<64xf32>
    %74 = vector.multi_reduction <add>, %73, %cst_21 [1] : vector<64x64xf32> to vector<64xf32>
    %75 = vector.shape_cast %74 : vector<64xf32> to vector<64x1xf32>
    %76 = arith.truncf %73 : vector<64x64xf32> to vector<64x64xbf16>
    %77 = vector.extract_strided_slice %4 {offsets = [0, 16], sizes = [64, 8], strides = [1, 1]} : vector<64x32xbf16> to vector<64x8xbf16>
    %cst_22 = arith.constant dense<0.000000e+00> : vector<64x8xf32>
    %78 = tpu.matmul %76, %77, %cst_22 {dimension_numbers = #tpu.dot_dimension_numbers<[1], [0], [0], [1], [0, 0, 1, 1], [], []>} : vector<64x64xbf16>, vector<64x8xbf16>, vector<64x8xf32> -> vector<64x8xf32>
    %79 = tpu.reciprocal %75 {approx = true} : vector<64x1xf32> -> vector<64x1xf32>
    %80 = vector.broadcast %79 : vector<64x1xf32> to vector<64x8xf32>
    %81 = arith.mulf %78, %80 : vector<64x8xf32>
    %82 = vector.extract_strided_slice %7 {offsets = [0, 3], sizes = [64, 1], strides = [1, 1]} : vector<64x4xf32> to vector<64x1xf32>
    %83 = vector.extract_strided_slice %9 {offsets = [3, 0], sizes = [1, 64], strides = [1, 1]} : vector<4x64xf32> to vector<1x64xf32>
    %84 = vector.broadcast %82 : vector<64x1xf32> to vector<64x64xf32>
    %85 = vector.broadcast %83 : vector<1x64xf32> to vector<64x64xf32>
    %86 = arith.addf %84, %85 : vector<64x64xf32>
    %cst_23 = arith.constant 0.000000e+00 : f32
    %87 = vector.broadcast %cst_23 : f32 to vector<64x64xf32>
    %88 = arith.cmpf ogt, %86, %87 : vector<64x64xf32>
    %cst_24 = arith.constant 2.000000e-01 : f32
    %89 = vector.broadcast %cst_24 : f32 to vector<64x64xf32>
    %90 = arith.mulf %89, %86 : vector<64x64xf32>
    %91 = arith.select %88, %86, %90 : vector<64x64xi1>, vector<64x64xf32>
    %cst_25 = arith.constant dense<0xFF800000> : vector<64xf32>
    %92 = vector.multi_reduction <maximumf>, %91, %cst_25 [1] : vector<64x64xf32> to vector<64xf32>
    %93 = vector.shape_cast %92 : vector<64xf32> to vector<64x1xf32>
    %94 = vector.broadcast %93 : vector<64x1xf32> to vector<64x64xf32>
    %95 = arith.subf %91, %94 : vector<64x64xf32>
    %96 = math.exp %95 : vector<64x64xf32>
    %97 = arith.mulf %0, %96 : vector<64x64xf32>
    %cst_26 = arith.constant dense<0.000000e+00> : vector<64xf32>
    %98 = vector.multi_reduction <add>, %97, %cst_26 [1] : vector<64x64xf32> to vector<64xf32>
    %99 = vector.shape_cast %98 : vector<64xf32> to vector<64x1xf32>
    %100 = arith.truncf %97 : vector<64x64xf32> to vector<64x64xbf16>
    %101 = vector.extract_strided_slice %4 {offsets = [0, 24], sizes = [64, 8], strides = [1, 1]} : vector<64x32xbf16> to vector<64x8xbf16>
    %cst_27 = arith.constant dense<0.000000e+00> : vector<64x8xf32>
    %102 = tpu.matmul %100, %101, %cst_27 {dimension_numbers = #tpu.dot_dimension_numbers<[1], [0], [0], [1], [0, 0, 1, 1], [], []>} : vector<64x64xbf16>, vector<64x8xbf16>, vector<64x8xf32> -> vector<64x8xf32>
    %103 = tpu.reciprocal %99 {approx = true} : vector<64x1xf32> -> vector<64x1xf32>
    %104 = vector.broadcast %103 : vector<64x1xf32> to vector<64x8xf32>
    %105 = arith.mulf %102, %104 : vector<64x8xf32>
    %106 = tpu.concatenate %33, %57, %81, %105 in 1 : vector<64x8xf32>, vector<64x8xf32>, vector<64x8xf32>, vector<64x8xf32> -> vector<64x32xf32>
    %c0_28 = arith.constant 0 : index
    %c0_29 = arith.constant 0 : index
    %107 = vector.load %arg4[%c0_28, %c0_29] : memref<1x32xf32, #tpu.memory_space<vmem>>, vector<1x32xf32>
    %108 = vector.broadcast %107 : vector<1x32xf32> to vector<64x32xf32>
    %109 = arith.addf %106, %108 : vector<64x32xf32>
    %cst_30 = arith.constant 0.000000e+00 : f32
    %110 = vector.broadcast %cst_30 : f32 to vector<64x32xf32>
    %111 = arith.cmpf ogt, %109, %110 : vector<64x32xf32>
    %cst_31 = arith.constant 0.000000e+00 : f32
    %112 = vector.broadcast %cst_31 : f32 to vector<64x32xf32>
    %113 = arith.minimumf %109, %112 : vector<64x32xf32>
    %114 = math.exp %113 : vector<64x32xf32>
    %cst_32 = arith.constant 1.000000e+00 : f32
    %115 = vector.broadcast %cst_32 : f32 to vector<64x32xf32>
    %116 = arith.subf %114, %115 : vector<64x32xf32>
    %117 = arith.select %111, %109, %116 : vector<64x32xi1>, vector<64x32xf32>
    %118 = arith.truncf %117 : vector<64x32xf32> to vector<64x32xbf16>
    %c0_33 = arith.constant 0 : index
    %c0_34 = arith.constant 0 : index
    %119 = vector.load %arg5[%c0_33, %c0_34] : memref<32x128xbf16, #tpu.memory_space<vmem>>, vector<32x128xbf16>
    %cst_35 = arith.constant dense<0.000000e+00> : vector<64x128xf32>
    %120 = tpu.matmul %118, %119, %cst_35 {dimension_numbers = #tpu.dot_dimension_numbers<[1], [0], [0], [1], [0, 0, 1, 1], [], []>} : vector<64x32xbf16>, vector<32x128xbf16>, vector<64x128xf32> -> vector<64x128xf32>
    %121 = arith.truncf %120 : vector<64x128xf32> to vector<64x128xbf16>
    %c0_36 = arith.constant 0 : index
    %c0_37 = arith.constant 0 : index
    %122 = vector.load %arg6[%c0_36, %c0_37] : memref<128x2xbf16, #tpu.memory_space<vmem>>, vector<128x2xbf16>
    %cst_38 = arith.constant dense<0.000000e+00> : vector<64x2xf32>
    %123 = tpu.matmul %121, %122, %cst_38 {dimension_numbers = #tpu.dot_dimension_numbers<[1], [0], [0], [1], [0, 0, 1, 1], [], []>} : vector<64x128xbf16>, vector<128x2xbf16>, vector<64x2xf32> -> vector<64x2xf32>
    %124 = vector.extract_strided_slice %123 {offsets = [0, 0], sizes = [64, 1], strides = [1, 1]} : vector<64x2xf32> to vector<64x1xf32>
    %125 = vector.extract_strided_slice %123 {offsets = [0, 1], sizes = [64, 1], strides = [1, 1]} : vector<64x2xf32> to vector<64x1xf32>
    %126 = tpu.transpose %125, [1, 0] : vector<64x1xf32> -> vector<1x64xf32>
    %127 = vector.broadcast %124 : vector<64x1xf32> to vector<64x64xf32>
    %128 = vector.broadcast %126 : vector<1x64xf32> to vector<64x64xf32>
    %129 = arith.addf %127, %128 : vector<64x64xf32>
    %cst_39 = arith.constant 0.000000e+00 : f32
    %130 = vector.broadcast %cst_39 : f32 to vector<64x64xf32>
    %131 = arith.cmpf ogt, %129, %130 : vector<64x64xf32>
    %cst_40 = arith.constant 2.000000e-01 : f32
    %132 = vector.broadcast %cst_40 : f32 to vector<64x64xf32>
    %133 = arith.mulf %132, %129 : vector<64x64xf32>
    %134 = arith.select %131, %129, %133 : vector<64x64xi1>, vector<64x64xf32>
    %cst_41 = arith.constant dense<0xFF800000> : vector<64xf32>
    %135 = vector.multi_reduction <maximumf>, %134, %cst_41 [1] : vector<64x64xf32> to vector<64xf32>
    %136 = vector.shape_cast %135 : vector<64xf32> to vector<64x1xf32>
    %137 = vector.broadcast %136 : vector<64x1xf32> to vector<64x64xf32>
    %138 = arith.subf %134, %137 : vector<64x64xf32>
    %139 = math.exp %138 : vector<64x64xf32>
    %140 = arith.mulf %0, %139 : vector<64x64xf32>
    %cst_42 = arith.constant dense<0.000000e+00> : vector<64xf32>
    %141 = vector.multi_reduction <add>, %140, %cst_42 [1] : vector<64x64xf32> to vector<64xf32>
    %142 = vector.shape_cast %141 : vector<64xf32> to vector<64x1xf32>
    %143 = arith.truncf %140 : vector<64x64xf32> to vector<64x64xbf16>
    %cst_43 = arith.constant dense<0.000000e+00> : vector<64x128xf32>
    %144 = tpu.matmul %143, %121, %cst_43 {dimension_numbers = #tpu.dot_dimension_numbers<[1], [0], [0], [1], [0, 0, 1, 1], [], []>} : vector<64x64xbf16>, vector<64x128xbf16>, vector<64x128xf32> -> vector<64x128xf32>
    %145 = tpu.reciprocal %142 {approx = true} : vector<64x1xf32> -> vector<64x1xf32>
    %146 = vector.broadcast %145 : vector<64x1xf32> to vector<64x128xf32>
    %147 = arith.mulf %144, %146 : vector<64x128xf32>
    %c0_44 = arith.constant 0 : index
    %c0_45 = arith.constant 0 : index
    %148 = vector.load %arg7[%c0_44, %c0_45] : memref<1x128xf32, #tpu.memory_space<vmem>>, vector<1x128xf32>
    %149 = vector.broadcast %148 : vector<1x128xf32> to vector<64x128xf32>
    %150 = arith.addf %147, %149 : vector<64x128xf32>
    %c0_46 = arith.constant 0 : index
    %c0_47 = arith.constant 0 : index
    %151 = vector.load %arg8[%c0_46, %c0_47] : memref<64x128xf32, #tpu.memory_space<vmem>>, vector<64x128xf32>
    tpu.vector_store %arg8[%c0_46, %c0_47], %150 {strides = array<i32>} : memref<64x128xf32, #tpu.memory_space<vmem>>, vector<64x128xf32>,
    return
  }
}

</mosaic_0001>

<bundles_post_ra>
// kernel: gat_forward.1
= control target key start
LH: loop header
LB: loop body
LE: loop exit
PB: predicated region body
PF: predicated region fallthrough
CT: control target
= control target key end

     0   :  { %vm74_vm0 = vcmask 130048   ;;  %vm172_vm1 = vcmask 261120   ;;  %s2600_s18 = smov 104   ;;  %s2601_s19 = smov 120   ;;  %v2603_v19 = vmov 0   ;;  %v2605_v33 = vmov 1   ;;  %s3452_s2 = inlined_call_operand.vmem [shape: bf16[16,32], index: 2, kind: input, shape index: {}]   ;;  %s3453_s0 = inlined_call_operand.vmem [shape: bf16[64,16], index: 0, kind: input, shape index: {}]   ;;  %s3454_s3 = inlined_call_operand.vmem [shape: bf16[32,8], index: 3, kind: input, shape index: {}]   ;;  %s3455_s1 = inlined_call_operand.vmem [shape: f32[64,64], index: 1, kind: input, shape index: {}]   ;;  %s3456_s5 = inlined_call_operand.vmem [shape: bf16[32,128], index: 5, kind: input, shape index: {}]   ;;  %s3457_s6 = inlined_call_operand.vmem [shape: bf16[128,2], index: 6, kind: input, shape index: {}]   ;;  %s3458_s4 = inlined_call_operand.vmem [shape: f32[1,32], index: 4, kind: input, shape index: {}]   ;;  %s3459_s7 = inlined_call_operand.vmem [shape: f32[1,128], index: 7, kind: input, shape index: {}]   ;;  %s3460_s8 = inlined_call_operand.vmem [shape: f32[64,128], index: 8, kind: output, shape index: {}]  }
   0x1   :  { %v2399_v0 = vld [vmem:[%s3452_s2] sm:$0xff]   ;;  %v2401_v2 = vld [vmem:[%s3453_s0 + $0x8] sm:$0xff]   ;;  %v2402_v3 = vld [vmem:[%s3453_s0 + $0x10] sm:$0xff]   ;;  %2365 = vset.pattern.permute.xlu1 %v2603_v19  ;;  %2369 = vset.pattern.permute.xlu0 %v2603_v19  ;;  %v2606_v35 = vmov 2   ;;  %v2607_v38 = vmov 3   ;;  %vm382_vm2 = vcmask 523264  }
   0x2   :  { %v2400_v1 = vld [vmem:[%s3453_s0] sm:$0xff]   ;;  %2214 = vmatprep.subr.bf16.mxu0 %v2399_v0  ;;  %v2403_v5 = vld [vmem:[%s3453_s0 + $0x18] sm:$0xff]   ;;  %v2405_v6 = vld [vmem:[%s3454_s3 + $0x8] sm:$0xff]   ;;  %s2602_s0 = smov 112   ;;  %s2608_s14 = smov 8  }
   0x3   :  { %2215 = vmatpush3.bf16.msra.mxu0 %v2399_v0  ;;  %2216 = vmatprep.mubr.msk.bf16.mxu0 %vm74_vm0, %v2400_v1  ;;  %v2404_v4 = vld [vmem:[%s3454_s3] sm:$0xff]   ;;  %s2604_s3 = smov 124   ;;  %s2609_s2 = smov 16  }
   0x4   :  { %2224 = vmatprep.subr.bf16.mxu1 %v2404_v4  ;;  %s2610_s15 = smov 24  }
   0x5   :  { %2225 = vmatpush3.bf16.msra.mxu1 %v2404_v4 }
   0x6   :  { %2217 = vmatmul.mubr.msk.bf16.vlgmr.msra.gmra.mrb[0].mxu0 %vm74_vm0, %v2401_v2  ;;  %2226 = vmatprep.subr.bf16.mxu1 %v2405_v6 }
   0x7   :  { %2220 = vmatprep.mubr.msk.bf16.mxu0 %vm74_vm0, %v2402_v3 }
   0x9   :  { %2227 = vmatpush3.bf16.msra.mxu1 %v2405_v6 }
   0xe   :  { %2221 = vmatmul.mubr.msk.bf16.gmra.mrb[4].mxu0 %vm74_vm0, %v2403_v5 }
  0xd9   :  { %v2218_v7 = vpop.f32.mrb[0].mxu0 }
  0xda   :  { %v121_v8 = vpop.f32.mrb[1].mxu0 }
  0xdb   :  { %v2219_v9 = vpop.f32.mrb[2].mxu0 }
  0xdc   :  { %v153_v10 = vpack.c.bf16 %v2219_v9, %v2218_v7  ;;  %v124_v11 = vpop.f32.mrb[3].mxu0 }
  0xdd   :  { %v152_v12 = vpack.c.bf16 %v124_v11, %v121_v8 }
  0xde   :  { %1232 = vrot.lane.b32.xlu1 %v153_v10, %s2600_s18  ;;  %718 = vrot.lane.b32.xlu0 %v153_v10, %s2601_s19 }
  0xdf   :  { %2228 = vmatprep.mubr.msk.bf16.mxu1 %vm172_vm1, %v152_v12  ;;  %2236 = vmatprep.subr.bf16.mxu0 %v152_v12 }
  0xe0   :  { %2229 = vmatmul.mubr.msk.bf16.vlgmr.msra.gmra.mrb[0].mxu1 %vm172_vm1, %v153_v10  ;;  %2237 = vmatpush3.bf16.msra.mxu0 %v152_v12 }
  0xe1   :  { %2238 = vmatprep.subr.bf16.mxu0 %v153_v10  ;;  %v2222_v13 = vpop.f32.mrb[4].mxu0 }
  0xe2   :  { %975 = vrot.lane.b32.xlu0 %v153_v10, %s2602_s0  ;;  %716 = vrot.lane.b32.xlu1 %v152_v12, %s2601_s19  ;;  %v137_v14 = vpop.f32.mrb[5].mxu0 }
  0xe3   :  { %v2223_v15 = vpop.f32.mrb[6].mxu0 }
  0xe4   :  { %2239 = vmatpush3.bf16.msra.mxu0 %v153_v10  ;;  %v2686_v16 = vpack.c.bf16 %v2223_v15, %v2222_v13  ;;  %v140_v17 = vpop.f32.mrb[7].mxu0  ;;  %v346_v13 = vlaneseq }
  0xe5   :  { %v154_v18 = vpack.c.bf16 %v140_v17, %v137_v14 }
  0xe6   :  { %973 = vrot.lane.b32.xlu1 %v152_v12, %s2602_s0  ;;  %722 = vrot.lane.b32.xlu0 %v2686_v16, %s2601_s19  ;;  %v2782_v15 = vshrl.u32 %v346_v13, 7 }
  0xe7   :  { %2232 = vmatprep.mubr.msk.bf16.mxu1 %vm172_vm1, %v154_v18  ;;  %2240 = vmatprep.subr.bf16.mxu0 %v154_v18 }
  0xe8   :  { %2233 = vmatmul.mubr.msk.bf16.gmra.mrb[4].mxu1 %vm172_vm1, %v2686_v16  ;;  %2241 = vmatpush3.bf16.msra.mxu0 %v154_v18 }
  0xe9   :  { %2242 = vmatprep.subr.bf16.mxu0 %v2686_v16 }
  0xea   :  { %1230 = vrot.lane.b32.xlu1 %v152_v12, %s2600_s18  ;;  %977 = vrot.lane.b32.xlu0 %v154_v18, %s2602_s0 }
  0xec   :  { %2243 = vmatpush3.bf16.msra.mxu0 %v2686_v16 }
  0xee   :  { %720 = vrot.lane.b32.xlu1 %v154_v18, %s2601_s19 }
  0xf2   :  { %1234 = vrot.lane.b32.xlu1 %v154_v18, %s2600_s18  ;;  %v348_v18 = vsub.s32 0, %v2782_v15 }
 0x150   :  { %v2700_v20 = vpop.permute.xlu1 %1232  ;;  %v719_v22 = vpop.permute.xlu0 %718 }
 0x154   :  { %v717_v21 = vpop.permute.xlu1 %716  ;;  %v2705_v24 = vpop.permute.xlu0 %975 }
 0x155   :  { %2252 = vmatprep.subr.bf16.mxu1 %v717_v21 }
 0x156   :  { %2253 = vmatpush3.bf16.msra.mxu1 %v717_v21  ;;  %v594_v21 = vsub.s32 1, %v2782_v15 }
 0x157   :  { %2254 = vmatprep.subr.bf16.mxu1 %v719_v22 }
 0x158   :  { %v2702_v23 = vpop.permute.xlu1 %973  ;;  %v723_v27 = vpop.permute.xlu0 %722 }
 0x159   :  { %2268 = vmatprep.subr.bf16.mxu0 %v2702_v23 }
 0x15a   :  { %2255 = vmatpush3.bf16.msra.mxu1 %v719_v22  ;;  %v1112_v22 = vsub.s32 3, %v2782_v15 }
 0x15c   :  { %v2707_v25 = vpop.permute.xlu1 %1230  ;;  %v2732_v39 = vpop.permute.xlu0 %977 }
 0x160   :  { %v721_v26 = vpop.permute.xlu1 %720 }
 0x161   :  { %2256 = vmatprep.subr.bf16.mxu1 %v721_v26 }
 0x162   :  { %2257 = vmatpush3.bf16.msra.mxu1 %v721_v26 }
 0x163   :  { %2258 = vmatprep.subr.bf16.mxu1 %v723_v27 }
 0x164   :  { %v2735_v41 = vpop.permute.xlu1 %1234 }
 0x166   :  { %2259 = vmatpush3.bf16.msra.mxu1 %v723_v27 }
 0x167   :  { %2284 = vmatprep.subr.bf16.mxu1 %v2707_v25 }
 0x1b3   :  { %v2230_v28 = vpop.f32.mrb[0].mxu1 }
 0x1b4   :  { %v219_v29 = vpop.f32.mrb[1].mxu1  ;;  %262 = vrot.lane.b32.xlu1 %v2230_v28, %s2604_s3 }
 0x1b5   :  { %v2231_v30 = vpop.f32.mrb[2].mxu1  ;;  %258 = vrot.lane.b32.xlu0 %v219_v29, %s2604_s3 }
 0x1b6   :  { %v222_v31 = vpop.f32.mrb[3].mxu1 }
 0x1b8   :  { %323 = vperm.xlu1 %2365, %v2230_v28  }
 0x1b9   :  { %315 = vperm.xlu0 %2369, %v219_v29  }
 0x1bb   :  { %v2234_v32 = vpop.f32.mrb[4].mxu1 }
 0x1bc   :  { %2366 = vset.pattern.permute.xlu1 %v2605_v33  ;;  %v235_v34 = vpop.f32.mrb[5].mxu1 }
 0x1bd   :  { %2371 = vset.pattern.permute.xlu0 %v2606_v35  ;;  %569 = vperm.xlu1 %2366, %v2230_v28   ;;  %v2235_v36 = vpop.f32.mrb[6].mxu1 }
 0x1be   :  { %822 = vperm.xlu0 %2371, %v219_v29   ;;  %v238_v37 = vpop.f32.mrb[7].mxu1 }
 0x1c1   :  { %2367 = vset.pattern.permute.xlu1 %v2606_v35 }
 0x1c2   :  { %2373 = vset.pattern.permute.xlu0 %v2603_v19  ;;  %830 = vperm.xlu1 %2367, %v2230_v28  }
 0x1c3   :  { %327 = vperm.xlu0 %2373, %v2231_v30  }
 0x1c6   :  { %2368 = vset.pattern.permute.xlu1 %v2607_v38 }
 0x1c7   :  { %2375 = vset.pattern.permute.xlu0 %v2606_v35  ;;  %1087 = vperm.xlu1 %2368, %v2230_v28  }
 0x1c8   :  { %834 = vperm.xlu0 %2375, %v2231_v30  }
 0x1cb   :  { %2370 = vset.pattern.permute.xlu1 %v2605_v33 }
 0x1cc   :  { %260 = vrot.lane.b32.xlu0 %v222_v31, %s2604_s3  ;;  %561 = vperm.xlu1 %2370, %v219_v29  }
 0x1cd   :  { %2378 = vset.pattern.permute.xlu0 %v2605_v33 }
 0x1d0   :  { %565 = vperm.xlu0 %2378, %v222_v31   ;;  %2372 = vset.pattern.permute.xlu1 %v2607_v38 }
 0x1d1   :  { %1079 = vperm.xlu1 %2372, %v219_v29  }
 0x1d4   :  { %2380 = vset.pattern.permute.xlu0 %v2607_v38 }
 0x1d5   :  { %1083 = vperm.xlu0 %2380, %v222_v31   ;;  %264 = vrot.lane.b32.xlu1 %v2231_v30, %s2604_s3 }
 0x1d6   :  { %2374 = vset.pattern.permute.xlu1 %v2605_v33 }
 0x1d9   :  { %573 = vperm.xlu1 %2374, %v2231_v30   ;;  %270 = vrot.lane.b32.xlu0 %v2234_v32, %s2604_s3 }
 0x1da   :  { %2385 = vset.pattern.permute.xlu0 %v2603_v19 }
 0x1dd   :  { %2376 = vset.pattern.permute.xlu1 %v2607_v38  ;;  %266 = vrot.lane.b32.xlu0 %v235_v34, %s2604_s3 }
 0x1de   :  { %1091 = vperm.xlu1 %2376, %v2231_v30  }
 0x1e1   :  { %331 = vperm.xlu0 %2385, %v235_v34  }
 0x1e2   :  { %2377 = vset.pattern.permute.xlu1 %v2603_v19 }
 0x1e3   :  { %319 = vperm.xlu1 %2377, %v222_v31  }
 0x1e5   :  { %2387 = vset.pattern.permute.xlu0 %v2606_v35 }
 0x1e6   :  { %838 = vperm.xlu0 %2387, %v235_v34  }
 0x1e7   :  { %2379 = vset.pattern.permute.xlu1 %v2606_v35 }
 0x1e8   :  { %826 = vperm.xlu1 %2379, %v222_v31  }
 0x1ea   :  { %2389 = vset.pattern.permute.xlu0 %v2603_v19 }
 0x1eb   :  { %343 = vperm.xlu0 %2389, %v2235_v36  }
 0x1ec   :  { %2381 = vset.pattern.permute.xlu1 %v2603_v19 }
 0x1ed   :  { %339 = vperm.xlu1 %2381, %v2234_v32  }
 0x1ef   :  { %2391 = vset.pattern.permute.xlu0 %v2606_v35 }
 0x1f0   :  { %850 = vperm.xlu0 %2391, %v2235_v36  }
 0x1f1   :  { %2382 = vset.pattern.permute.xlu1 %v2605_v33 }
 0x1f2   :  { %585 = vperm.xlu1 %2382, %v2234_v32  }
 0x1f4   :  { %2394 = vset.pattern.permute.xlu0 %v2605_v33 }
 0x1f5   :  { %581 = vperm.xlu0 %2394, %v238_v37  }
 0x1f6   :  { %2383 = vset.pattern.permute.xlu1 %v2606_v35 }
 0x1f7   :  { %846 = vperm.xlu1 %2383, %v2234_v32  }
 0x1f9   :  { %2396 = vset.pattern.permute.xlu0 %v2607_v38 }
 0x1fa   :  { %1099 = vperm.xlu0 %2396, %v238_v37  }
 0x1fb   :  { %2384 = vset.pattern.permute.xlu1 %v2607_v38 }
 0x1fc   :  { %1103 = vperm.xlu1 %2384, %v2234_v32  }
 0x200   :  { %2386 = vset.pattern.permute.xlu1 %v2605_v33 }
 0x201   :  { %577 = vperm.xlu1 %2386, %v235_v34  }
 0x205   :  { %2388 = vset.pattern.permute.xlu1 %v2607_v38 }
 0x206   :  { %1095 = vperm.xlu1 %2388, %v235_v34  }
 0x20a   :  { %272 = vrot.lane.b32.xlu1 %v2235_v36, %s2604_s3 }
 0x20b   :  { %2390 = vset.pattern.permute.xlu1 %v2605_v33 }
 0x20e   :  { %589 = vperm.xlu1 %2390, %v2235_v36  }
 0x212   :  { %2392 = vset.pattern.permute.xlu1 %v2607_v38 }
 0x213   :  { %1107 = vperm.xlu1 %2392, %v2235_v36  }
 0x217   :  { %268 = vrot.lane.b32.xlu1 %v238_v37, %s2604_s3 }
 0x218   :  { %2393 = vset.pattern.permute.xlu1 %v2603_v19 }
 0x21b   :  { %335 = vperm.xlu1 %2393, %v238_v37  }
 0x21f   :  { %2395 = vset.pattern.permute.xlu1 %v2606_v35 }
 0x220   :  { %842 = vperm.xlu1 %2395, %v238_v37  }
 0x224   :  { %2398 = vset.pattern.permute.xlu1 %v2603_v19 }
 0x226   :  { %v263_v42 = vpop.permute.xlu1 %262 }
 0x227   :  { %v259_v40 = vpop.permute.xlu0 %258 }
 0x228   :  { %282 = vxpose.xlu0.b32.start [1/8] (short) (narrow) %v259_v40, 8 }
 0x237   :  { %v324_v43 = vpop.permute.xlu1 %323 }
 0x238   :  { %v316_v44 = vpop.permute.xlu0 %315 }
 0x23c   :  { %v2737_v45 = vpop.permute.xlu1 %569 }
 0x23d   :  { %v2739_v46 = vpop.permute.xlu0 %822 }
 0x241   :  { %v2741_v47 = vpop.permute.xlu1 %830 }
 0x242   :  { %v2743_v48 = vpop.permute.xlu0 %327 }
 0x246   :  { %v2745_v49 = vpop.permute.xlu1 %1087 }
 0x247   :  { %v835_v50 = vpop.permute.xlu0 %834 }
 0x24b   :  { %v261_v51 = vpop.permute.xlu0 %260  ;;  %v2747_v52 = vpop.permute.xlu1 %561 }
 0x24c   :  { %283 = vxpose.xlu0.b32.cont [2/8] (short) (narrow) %v261_v51, 8 }
 0x24f   :  { %v2749_v53 = vpop.permute.xlu0 %565 }
 0x250   :  { %v2751_v54 = vpop.permute.xlu1 %1079  ;;  %284 = vxpose.xlu0.b32.cont [3/8] (short) (narrow) %v263_v42, 8 }
 0x254   :  { %v1084_v55 = vpop.permute.xlu0 %1083  ;;  %v265_v56 = vpop.permute.xlu1 %264 }
 0x255   :  { %285 = vxpose.xlu0.b32.cont [4/8] (short) (narrow) %v265_v56, 8 }
 0x258   :  { %v574_v57 = vpop.permute.xlu1 %573  ;;  %v271_v58 = vpop.permute.xlu0 %270 }
 0x25c   :  { %v267_v59 = vpop.permute.xlu0 %266 }
 0x25d   :  { %v1092_v60 = vpop.permute.xlu1 %1091  ;;  %286 = vxpose.xlu0.b32.cont [5/8] (short) (narrow) %v267_v59, 8 }
 0x260   :  { %v2772_v9 = vpop.permute.xlu0 %331 }
 0x262   :  { %v320_v61 = vpop.permute.xlu1 %319 }
 0x265   :  { %v2774_v10 = vpop.permute.xlu0 %838 }
 0x267   :  { %v2753_v62 = vpop.permute.xlu1 %826 }
 0x26a   :  { %v2776_v11 = vpop.permute.xlu0 %343 }
 0x26c   :  { %v2755_v63 = vpop.permute.xlu1 %339 }
 0x26f   :  { %v2778_v12 = vpop.permute.xlu0 %850 }
 0x271   :  { %v2757_v0 = vpop.permute.xlu1 %585 }
 0x274   :  { %v2780_v14 = vpop.permute.xlu0 %581 }
 0x276   :  { %v2759_v1 = vpop.permute.xlu1 %846 }
 0x279   :  { %v2784_v17 = vpop.permute.xlu0 %1099 }
 0x27b   :  { %v2761_v2 = vpop.permute.xlu1 %1103 }
 0x280   :  { %v2763_v3 = vpop.permute.xlu1 %577 }
 0x285   :  { %v2765_v4 = vpop.permute.xlu1 %1095 }
 0x289   :  { %v273_v5 = vpop.permute.xlu1 %272 }
 0x28d   :  { %v2767_v6 = vpop.permute.xlu1 %589 }
 0x292   :  { %v2769_v7 = vpop.permute.xlu1 %1107 }
 0x296   :  { %v269_v8 = vpop.permute.xlu1 %268 }
 0x297   :  { %287 = vxpose.xlu0.b32.cont [6/8] (short) (narrow) %v269_v8, 8 }
 0x29a   :  { %v2807_v42 = vpop.permute.xlu1 %335 }
 0x29b   :  { %288 = vxpose.xlu0.b32.cont [7/8] (short) (narrow) %v271_v58, 8 }
 0x29f   :  { %289 = vxpose.xlu0.b32.end [8/8] (short) (narrow) %v273_v5, 8  ;;  %v843_v13 = vpop.permute.xlu1 %842 }
 0x2c8   :  { %2397 = vset.pattern.permute.xlu0 %v2603_v19  ;;  %v855_v19 = vsub.s32 2, %v2782_v15 }
 0x303   :  { %v298_v26 = vpop.trf.xlu0 }
 0x304   :  { %v2792_v27 = vrot.slane %v298_v26, %v348_v18  ;;  %v2794_v28 = vrot.slane %v298_v26, %v594_v21  ;;  %v2796_v29 = vrot.slane %v298_v26, %v855_v19  ;;  %v2798_v30 = vrot.slane %v298_v26, %v1112_v22 }
 0x306   :  { %v599_v31 = vadd.f32 %v2794_v28, %v574_v57  ;;  %v350_v32 = vadd.f32 %v2792_v27, %v316_v44  ;;  %v860_v33 = vadd.f32 %v2796_v29, %v835_v50  ;;  %v351_v34 = vadd.f32 %v2792_v27, %v320_v61 }
 0x307   :  { %v1115_v35 = vadd.f32 %v2798_v30, %v1084_v55  ;;  %v352_v36 = vadd.f32 %v2792_v27, %v324_v43  ;;  %v1117_v37 = vadd.f32 %v2798_v30, %v1092_v60  ;;  %v353_v43 = vadd.f32 %v2792_v27, %v2743_v48 }
 0x308   :  { %vm607_vm3 = vcmp.gt.f32.partialorder %v599_v31, 0.0  ;;  %v615_v38 = vmul.f32 0.2, %v599_v31  ;;  %vm358_vm4 = vcmp.gt.f32.partialorder %v350_v32, 0.0  ;;  %v366_v40 = vmul.f32 0.2, %v350_v32 }
 0x309   :  { %vm868_vm5 = vcmp.gt.f32.partialorder %v860_v33, 0.0  ;;  %v876_v51 = vmul.f32 0.2, %v860_v33  ;;  %vm359_vm6 = vcmp.gt.f32.partialorder %v351_v34, 0.0  ;;  %v367_v44 = vmul.f32 0.2, %v351_v34 }
 0x30a   :  { %v2809_v50 = vsel %vm607_vm3, %v599_v31, %v615_v38  ;;  %v2811_v56 = vsel %vm358_vm4, %v350_v32, %v366_v40  ;;  %v1131_v57 = vmul.f32 0.2, %v1115_v35  ;;  %vm1123_vm7 = vcmp.gt.f32.partialorder %v1115_v35, 0.0 }
 0x30b   :  { %v637_v55 = vsel %vm382_vm2, %v2809_v50, -inf  ;;  %v383_v58 = vsel %vm382_vm2, %v2811_v56, -inf  ;;  %v2819_v59 = vsel %vm868_vm5, %v860_v33, %v876_v51  ;;  %v2821_v60 = vsel %vm359_vm6, %v351_v34, %v367_v44 }
 0x30c   :  { %638 = vmax.xlane.f32.xlu0 %v637_v55  ;;  %384 = vmax.xlane.f32.xlu1 %v383_v58  ;;  %vm360_vm8 = vcmp.gt.f32.partialorder %v352_v36, 0.0  ;;  %v368_v61 = vmul.f32 0.2, %v352_v36  ;;  %v898_v5 = vsel %vm382_vm2, %v2819_v59, -inf  ;;  %v386_v48 = vsel %vm382_vm2, %v2821_v60, -inf }
 0x30d   :  { %v1133_v8 = vmul.f32 0.2, %v1117_v37  ;;  %v2827_v21 = vsel %vm1123_vm7, %v1115_v35, %v1131_v57  ;;  %vm1125_vm9 = vcmp.gt.f32.partialorder %v1117_v37, 0.0  ;;  %v369_v19 = vmul.f32 0.2, %v353_v43 }
 0x30e   :  { %v596_v22 = vadd.f32 %v2794_v28, %v2747_v52  ;;  %v2831_v26 = vsel %vm360_vm8, %v352_v36, %v368_v61  ;;  %vm361_vm10 = vcmp.gt.f32.partialorder %v353_v43, 0.0  ;;  %v862_v31 = vadd.f32 %v2796_v29, %v843_v13 }
 0x30f   :  { %v1149_v32 = vsel %vm382_vm2, %v2827_v21, -inf  ;;  %v2836_v33 = vsel %vm1125_vm9, %v1117_v37, %v1133_v8  ;;  %v597_v34 = vadd.f32 %v2794_v28, %v2749_v53  ;;  %v389_v35 = vsel %vm382_vm2, %v2831_v26, -inf }
 0x310   :  { %899 = vmax.xlane.f32.xlu0 %v898_v5  ;;  %387 = vmax.xlane.f32.xlu1 %v386_v48  ;;  %v2842_v38 = vsel %vm361_vm10, %v353_v43, %v369_v19  ;;  %v612_v52 = vmul.f32 0.2, %v596_v22  ;;  %v864_v36 = vadd.f32 %v2796_v29, %v2778_v12  ;;  %vm604_vm11 = vcmp.gt.f32.partialorder %v596_v22, 0.0 }
 0x311   :  { %v878_v40 = vmul.f32 0.2, %v862_v31  ;;  %vm870_vm12 = vcmp.gt.f32.partialorder %v862_v31, 0.0  ;;  %v1155_v37 = vsel %vm382_vm2, %v2836_v33, -inf  ;;  %v392_v53 = vsel %vm382_vm2, %v2842_v38, -inf }
 0x312   :  { %v2850_v51 = vsel %vm604_vm11, %v596_v22, %v612_v52  ;;  %v613_v44 = vmul.f32 0.2, %v597_v34  ;;  %v880_v57 = vmul.f32 0.2, %v864_v36  ;;  %v598_v43 = vadd.f32 %v2794_v28, %v2737_v45 }
 0x313   :  { %v2854_v12 = vsel %vm870_vm12, %v862_v31, %v878_v40  ;;  %vm605_vm13 = vcmp.gt.f32.partialorder %v597_v34, 0.0  ;;  %vm872_vm14 = vcmp.gt.f32.partialorder %v864_v36, 0.0  ;;  %v1119_v55 = vadd.f32 %v2798_v30, %v2784_v17 }
 0x314   :  { %1150 = vmax.xlane.f32.xlu0 %v1149_v32  ;;  %390 = vmax.xlane.f32.xlu1 %v389_v35  ;;  %v628_v58 = vsel %vm382_vm2, %v2850_v51, -inf  ;;  %v904_v61 = vsel %vm382_vm2, %v2854_v12, -inf  ;;  %v2862_v5 = vsel %vm605_vm13, %v597_v34, %v613_v44  ;;  %v2864_v48 = vsel %vm872_vm14, %v864_v36, %v880_v57 }
 0x315   :  { %v614_v45 = vmul.f32 0.2, %v598_v43  ;;  %vm606_vm15 = vcmp.gt.f32.partialorder %v598_v43, 0.0  ;;  %v1135_v8 = vmul.f32 0.2, %v1119_v55  ;;  %v354_v13 = vadd.f32 %v2792_v27, %v2772_v9 }
 0x316   :  { %v1121_v17 = vadd.f32 %v2798_v30, %v2769_v7  ;;  %vm1127_vm3 = vcmp.gt.f32.partialorder %v1119_v55, 0.0  ;;  %v631_v19 = vsel %vm382_vm2, %v2862_v5, -inf  ;;  %v910_v22 = vsel %vm382_vm2, %v2864_v48, -inf }
 0x317   :  { %v2874_v31 = vsel %vm606_vm15, %v598_v43, %v614_v45  ;;  %v2876_v32 = vsel %vm1127_vm3, %v1119_v55, %v1135_v8  ;;  %v370_v34 = vmul.f32 0.2, %v354_v13  ;;  %v355_v9 = vadd.f32 %v2792_v27, %v2807_v42 }
 0x318   :  { %1156 = vmax.xlane.f32.xlu0 %v1155_v37  ;;  %393 = vmax.xlane.f32.xlu1 %v392_v53  ;;  %v1137_v35 = vmul.f32 0.2, %v1121_v17  ;;  %vm362_vm4 = vcmp.gt.f32.partialorder %v354_v13, 0.0  ;;  %vm1129_vm5 = vcmp.gt.f32.partialorder %v1121_v17, 0.0  ;;  %v634_v7 = vsel %vm382_vm2, %v2874_v31, -inf }
 0x319   :  { %v1161_v52 = vsel %vm382_vm2, %v2876_v32, -inf  ;;  %v2884_v36 = vsel %vm362_vm4, %v354_v13, %v370_v34  ;;  %v371_v37 = vmul.f32 0.2, %v355_v9  ;;  %v356_v53 = vadd.f32 %v2792_v27, %v2755_v63 }
 0x31a   :  { %v2886_v40 = vsel %vm1129_vm5, %v1121_v17, %v1137_v35  ;;  %vm363_vm6 = vcmp.gt.f32.partialorder %v355_v9, 0.0  ;;  %v395_v42 = vsel %vm382_vm2, %v2884_v36, -inf  ;;  %v357_v55 = vadd.f32 %v2792_v27, %v2776_v11 }
 0x31b   :  { %v1167_v44 = vsel %vm382_vm2, %v2886_v40, -inf  ;;  %v2894_v57 = vsel %vm363_vm6, %v355_v9, %v371_v37  ;;  %v372_v43 = vmul.f32 0.2, %v356_v53  ;;  %vm364_vm7 = vcmp.gt.f32.partialorder %v356_v53, 0.0 }
 0x31c   :  { %629 = vmax.xlane.f32.xlu1 %v628_v58  ;;  %905 = vmax.xlane.f32.xlu0 %v904_v61  ;;  %v398_v58 = vsel %vm382_vm2, %v2894_v57, -inf  ;;  %v373_v61 = vmul.f32 0.2, %v357_v55  ;;  %v600_v45 = vadd.f32 %v2794_v28, %v2763_v3  ;;  %vm365_vm8 = vcmp.gt.f32.partialorder %v357_v55, 0.0 }
 0x31d   :  { %v2900_v63 = vsel %vm364_vm7, %v356_v53, %v372_v43  ;;  %v601_v11 = vadd.f32 %v2794_v28, %v2780_v14  ;;  %v602_v3 = vadd.f32 %v2794_v28, %v2757_v0  ;;  %v603_v14 = vadd.f32 %v2794_v28, %v2767_v6 }
 0x31e   :  { %v401_v8 = vsel %vm382_vm2, %v2900_v63, -inf  ;;  %v2906_v13 = vsel %vm365_vm8, %v357_v55, %v373_v61  ;;  %v616_v17 = vmul.f32 0.2, %v600_v45  ;;  %vm608_vm9 = vcmp.gt.f32.partialorder %v600_v45, 0.0 }
 0x31f   :  { %v404_v27 = vsel %vm382_vm2, %v2906_v13, -inf  ;;  %vm609_vm10 = vcmp.gt.f32.partialorder %v601_v11, 0.0  ;;  %v618_v9 = vmul.f32 0.2, %v602_v3  ;;  %vm610_vm11 = vcmp.gt.f32.partialorder %v602_v3, 0.0 }
 0x320   :  { %632 = vmax.xlane.f32.xlu1 %v631_v19  ;;  %911 = vmax.xlane.f32.xlu0 %v910_v22  ;;  %v2912_v19 = vsel %vm608_vm9, %v600_v45, %v616_v17  ;;  %v617_v22 = vmul.f32 0.2, %v601_v11  ;;  %v619_v37 = vmul.f32 0.2, %v603_v14  ;;  %v857_v0 = vadd.f32 %v2796_v29, %v2739_v46 }
 0x321   :  { %v640_v34 = vsel %vm382_vm2, %v2912_v19, -inf  ;;  %vm611_vm12 = vcmp.gt.f32.partialorder %v603_v14, 0.0  ;;  %v859_v55 = vadd.f32 %v2796_v29, %v2741_v47  ;;  %v1116_v47 = vadd.f32 %v2798_v30, %v2745_v49 }
 0x322   :  { %v2918_v35 = vsel %vm609_vm10, %v601_v11, %v617_v22  ;;  %v2932_v6 = vsel %vm611_vm12, %v603_v14, %v619_v37  ;;  %v873_v28 = vmul.f32 0.2, %v857_v0  ;;  %vm865_vm13 = vcmp.gt.f32.partialorder %v857_v0, 0.0 }
 0x323   :  { %v875_v45 = vmul.f32 0.2, %v859_v55  ;;  %vm867_vm15 = vcmp.gt.f32.partialorder %v859_v55, 0.0  ;;  %vm1124_vm4 = vcmp.gt.f32.partialorder %v1116_v47, 0.0  ;;  %v863_v49 = vadd.f32 %v2796_v29, %v2759_v1 }
 0x324   :  { %635 = vmax.xlane.f32.xlu1 %v634_v7  ;;  %1162 = vmax.xlane.f32.xlu0 %v1161_v52  ;;  %v643_v7 = vsel %vm382_vm2, %v2918_v35, -inf  ;;  %v2924_v52 = vsel %vm610_vm11, %v602_v3, %v618_v9  ;;  %v2938_v46 = vsel %vm865_vm13, %v857_v0, %v873_v28  ;;  %v1132_v3 = vmul.f32 0.2, %v1116_v47 }
 0x325   :  { %v646_v53 = vsel %vm382_vm2, %v2924_v52, -inf  ;;  %v2950_v17 = vsel %vm867_vm15, %v859_v55, %v875_v45  ;;  %v879_v0 = vmul.f32 0.2, %v863_v49  ;;  %vm871_vm6 = vcmp.gt.f32.partialorder %v863_v49, 0.0 }
 0x326   :  { %v2962_v9 = vsel %vm1124_vm4, %v1116_v47, %v1132_v3  ;;  %v1120_v1 = vadd.f32 %v2798_v30, %v2761_v2  ;;  %vm1431_vm9 = vcmask 64512   ;;  %vm1448_vm10 = vcmask 195584  }
 0x327   :  { %v2974_v28 = vsel %vm871_vm6, %v863_v49, %v879_v0 }
 0x328   :  { %396 = vmax.xlane.f32.xlu1 %v395_v42  ;;  %1168 = vmax.xlane.f32.xlu0 %v1167_v44  ;;  %v858_v42 = vadd.f32 %v2796_v29, %v2753_v62  ;;  %v649_v44 = vsel %vm382_vm2, %v2932_v6, -inf  ;;  %v1114_v62 = vadd.f32 %v2798_v30, %v2751_v54  ;;  %v861_v54 = vadd.f32 %v2796_v29, %v2774_v10 }
 0x329   :  { %v1118_v10 = vadd.f32 %v2798_v30, %v2765_v4  ;;  %v907_v29 = vsel %vm382_vm2, %v2974_v28, -inf  ;;  %vm1128_vm8 = vcmp.gt.f32.partialorder %v1120_v1, 0.0 }
 0x32a   :  { %v874_v43 = vmul.f32 0.2, %v858_v42  ;;  %vm866_vm14 = vcmp.gt.f32.partialorder %v858_v42, 0.0  ;;  %v1130_v11 = vmul.f32 0.2, %v1114_v62  ;;  %vm1122_vm3 = vcmp.gt.f32.partialorder %v1114_v62, 0.0 }
 0x32b   :  { %v877_v14 = vmul.f32 0.2, %v861_v54  ;;  %vm869_vm5 = vcmp.gt.f32.partialorder %v861_v54, 0.0  ;;  %vm1126_vm7 = vcmp.gt.f32.partialorder %v1118_v10, 0.0 }
 0x32c   :  { %399 = vmax.xlane.f32.xlu1 %v398_v58  ;;  %v889_v58 = vsel %vm382_vm2, %v2938_v46, -inf  ;;  %v2944_v61 = vsel %vm866_vm14, %v858_v42, %v874_v43  ;;  %v2956_v22 = vsel %vm1122_vm3, %v1114_v62, %v1130_v11  ;;  %v1134_v42 = vmul.f32 0.2, %v1118_v10 }
 0x32d   :  { %v2968_v37 = vsel %vm869_vm5, %v861_v54, %v877_v14  ;;  %v1136_v43 = vmul.f32 0.2, %v1120_v1 }
 0x32f   :  { %v2984_v55 = vsel %vm1128_vm8, %v1120_v1, %v1136_v43 }
 0x330   :  { %402 = vmax.xlane.f32.xlu1 %v401_v8  ;;  %v892_v8 = vsel %vm382_vm2, %v2944_v61, -inf }
 0x334   :  { %405 = vmax.xlane.f32.xlu1 %v404_v27  ;;  %v895_v27 = vsel %vm382_vm2, %v2950_v17, -inf }
 0x338   :  { %641 = vmax.xlane.f32.xlu1 %v640_v34  ;;  %v1146_v34 = vsel %vm382_vm2, %v2956_v22, -inf }
 0x33c   :  { %644 = vmax.xlane.f32.xlu1 %v643_v7  ;;  %v1152_v7 = vsel %vm382_vm2, %v2962_v9, -inf }
 0x33e   :  { %979 = vrot.lane.b32.xlu0 %v2686_v16, %s2602_s0 }
 0x340   :  { %647 = vmax.xlane.f32.xlu1 %v646_v53  ;;  %v901_v53 = vsel %vm382_vm2, %v2968_v37, -inf }
 0x344   :  { %650 = vmax.xlane.f32.xlu1 %v649_v44  ;;  %v2980_v44 = vsel %vm1126_vm7, %v1118_v10, %v1134_v42  ;;  %v3011_v42 = vld [vmem:[%s3455_s1 + $0x8] sm:$0xff] }
 0x345   :  { %v1158_v4 = vsel %vm382_vm2, %v2980_v44, -inf }
 0x348   :  { %890 = vmax.xlane.f32.xlu1 %v889_v58  ;;  %v1164_v58 = vsel %vm382_vm2, %v2984_v55, -inf }
 0x34c   :  { %893 = vmax.xlane.f32.xlu1 %v892_v8 }
 0x350   :  { %896 = vmax.xlane.f32.xlu1 %v895_v27 }
 0x354   :  { %1147 = vmax.xlane.f32.xlu1 %v1146_v34 }
 0x358   :  { %1153 = vmax.xlane.f32.xlu1 %v1152_v7 }
 0x35c   :  { %902 = vmax.xlane.f32.xlu1 %v901_v53 }
 0x360   :  { %908 = vmax.xlane.f32.xlu1 %v907_v29 }
 0x364   :  { %1159 = vmax.xlane.f32.xlu1 %v1158_v4 }
 0x368   :  { %1165 = vmax.xlane.f32.xlu1 %v1164_v58 }
 0x379   :  { %1236 = vrot.lane.b32.xlu1 %v2686_v16, %s2600_s18 }
 0x399   :  { %v639_v2 = vpop.xlane.xlu0 %638  ;;  %v385_v30 = vpop.xlane.xlu1 %384 }
 0x39a   :  { %v407_v45 = vsub.f32 %v2811_v56, %v385_v30  ;;  %v655_v29 = vsub.f32 %v2809_v50, %v639_v2  ;;  %v3030_v2 = vld [vmem:[%s3455_s1 + $0x10] sm:$0xff] }
 0x39c   :  { %v415_v62 = vmul.f32 1.442695, %v407_v45 }
 0x39d   :  { %v2991_v8 = vpop.xlane.xlu0 %899  ;;  %v388_v11 = vpop.xlane.xlu1 %387 }
 0x39e   :  { %v408_v47 = vsub.f32 %v2821_v60, %v388_v11  ;;  %2416 = vpow2.f32 %v415_v62  ;;  %v666_v62 = vmul.f32 1.442695, %v655_v29 }
 0x3a0   :  { %v417_v27 = vmul.f32 1.442695, %v408_v47 }
 0x3a1   :  { %v2994_v3 = vpop.xlane.xlu0 %1150  ;;  %v391_v54 = vpop.xlane.xlu1 %390 }
 0x3a2   :  { %v409_v34 = vsub.f32 %v2831_v26, %v391_v54  ;;  %2418 = vpow2.f32 %v417_v27  ;;  %v3006_v26 = vld [vmem:[%s3455_s1] sm:$0xff] }
 0x3a4   :  { %v419_v14 = vmul.f32 1.442695, %v409_v34  ;;  %v3035_v34 = vld [vmem:[%s3455_s1 + $0x18] sm:$0xff] }
 0x3a5   :  { %v2997_v16 = vpop.xlane.xlu0 %1156  ;;  %v394_v49 = vpop.xlane.xlu1 %393 }
 0x3a6   :  { %v410_v56 = vsub.f32 %v2842_v38, %v394_v49  ;;  %2420 = vpow2.f32 %v419_v14 }
 0x3a8   :  { %v421_v7 = vmul.f32 1.442695, %v410_v56  ;;  %v2417_v60 = vpop.eup %2416 }
 0x3a9   :  { %v630_v0 = vpop.xlane.xlu1 %629  ;;  %v3001_v53 = vpop.xlane.xlu0 %905  ;;  %v3016_v4 = vmul.f32 %v2417_v60, %v3006_v26 }
 0x3aa   :  { %v652_v10 = vsub.f32 %v2850_v51, %v630_v0  ;;  %2422 = vpow2.f32 %v421_v7 }
 0x3ac   :  { %v660_v38 = vmul.f32 1.442695, %v652_v10  ;;  %v2419_v1 = vpop.eup %2418 }
 0x3ad   :  { %v633_v43 = vpop.xlane.xlu1 %632  ;;  %v3019_v58 = vmul.f32 %v2419_v1, %v3011_v42  ;;  %v3023_v11 = vpop.xlane.xlu0 %911 }
 0x3ae   :  { %v653_v51 = vsub.f32 %v2862_v5, %v633_v43  ;;  %2424 = vpow2.f32 %v660_v38 }
 0x3af   :  { %v463_v45 = vpack.c.bf16 %v3019_v58, %v3016_v4 }
 0x3b0   :  { %v662_v30 = vmul.f32 1.442695, %v653_v51  ;;  %v2421_v5 = vpop.eup %2420 }
 0x3b1   :  { %v636_v47 = vpop.xlane.xlu1 %635  ;;  %2244 = vmatprep.mubr.msk.bf16.mxu0 %vm382_vm2, %v463_v45  ;;  %v3038_v49 = vmul.f32 %v2421_v5, %v3030_v2  ;;  %v3044_v7 = vpop.xlane.xlu0 %1162 }
 0x3b2   :  { %v654_v50 = vsub.f32 %v2874_v31, %v636_v47  ;;  %2426 = vpow2.f32 %v662_v30 }
 0x3b3   :  { %2428 = vpow2.f32 %v666_v62 }
 0x3b4   :  { %v664_v27 = vmul.f32 1.442695, %v654_v50  ;;  %v2423_v54 = vpop.eup %2422 }
 0x3b5   :  { %v397_v14 = vpop.xlane.xlu1 %396  ;;  %v3041_v31 = vmul.f32 %v2423_v54, %v3035_v34  ;;  %v3054_v30 = vpop.xlane.xlu0 %1168 }
 0x3b6   :  { %v411_v56 = vsub.f32 %v2884_v36, %v397_v14  ;;  %2430 = vpow2.f32 %v664_v27 }
 0x3b7   :  { %v464_v0 = vpack.c.bf16 %v3041_v31, %v3038_v49 }
 0x3b8   :  { %v423_v10 = vmul.f32 1.442695, %v411_v56  ;;  %v2425_v60 = vpop.eup %2424 }
 0x3b9   :  { %v400_v38 = vpop.xlane.xlu1 %399  ;;  %2245 = vmatmul.mubr.msk.bf16.vlgmr.msra.gmra.mrb[8].mxu0 %vm382_vm2, %v464_v0  ;;  %v676_v29 = vmul.f32 %v2425_v60, %v3006_v26  ;;  %v980_v0 = vpop.permute.xlu0 %979 }
 0x3ba   :  { %v412_v1 = vsub.f32 %v2894_v57, %v400_v38  ;;  %2269 = vmatpush3.bf16.msra.mxu0 %v2702_v23  ;;  %2432 = vpow2.f32 %v423_v10 }
 0x3bb   :  { %2270 = vmatprep.subr.bf16.mxu0 %v2705_v24  ;;  %v684_v36 = vsel %vm382_vm2, %v676_v29, 0.0 }
 0x3bc   :  { %v425_v43 = vmul.f32 1.442695, %v412_v1  ;;  %v2427_v51 = vpop.eup %2426  ;;  %685 = vadd.xlane.f32.xlu0 %v684_v36 }
 0x3bd   :  { %v403_v45 = vpop.xlane.xlu1 %402  ;;  %v677_v57 = vmul.f32 %v2427_v51, %v3011_v42  ;;  %v2429_v47 = vpop.eup %2428  ;;  %v3080_v51 = vld [vmem:[%s3455_s1 + $0x28] sm:$0xff] }
 0x3be   :  { %2434 = vpow2.f32 %v425_v43  ;;  %v413_v62 = vsub.f32 %v2900_v63, %v403_v45  ;;  %2271 = vmatpush3.bf16.msra.mxu0 %v2705_v24  ;;  %v679_v56 = vmul.f32 %v2429_v47, %v3035_v34 }
 0x3bf   :  { %2272 = vmatprep.subr.bf16.mxu0 %v2732_v39  ;;  %v687_v50 = vsel %vm382_vm2, %v677_v57, 0.0  ;;  %v708_v5 = vpack.c.bf16 %v677_v57, %v676_v29  ;;  %v3072_v29 = vld [vmem:[%s3455_s1 + $0x20] sm:$0xff] }
 0x3c0   :  { %v427_v23 = vmul.f32 1.442695, %v413_v62  ;;  %v2431_v27 = vpop.eup %2430  ;;  %688 = vadd.xlane.f32.xlu1 %v687_v50  ;;  %v693_v36 = vsel %vm382_vm2, %v679_v56, 0.0 }
 0x3c1   :  { %v406_v54 = vpop.xlane.xlu1 %405  ;;  %2260 = vmatprep.mubr.msk.bf16.mxu1 %vm382_vm2, %v708_v5  ;;  %v678_v63 = vmul.f32 %v2431_v27, %v3030_v2 }
 0x3c2   :  { %v414_v14 = vsub.f32 %v2906_v13, %v406_v54  ;;  %2273 = vmatpush3.bf16.msra.mxu0 %v2732_v39  ;;  %2436 = vpow2.f32 %v427_v23  ;;  %v3104_v54 = vld [vmem:[%s3455_s1 + $0x38] sm:$0xff] }
 0x3c3   :  { %2274 = vmatprep.subr.bf16.mxu0 %v980_v0  ;;  %v690_v10 = vsel %vm382_vm2, %v678_v63, 0.0  ;;  %v709_v60 = vpack.c.bf16 %v679_v56, %v678_v63 }
 0x3c4   :  { %v429_v24 = vmul.f32 1.442695, %v414_v14  ;;  %691 = vadd.xlane.f32.xlu0 %v690_v10  ;;  %v2433_v1 = vpop.eup %2432 }
 0x3c5   :  { %v642_v38 = vpop.xlane.xlu1 %641  ;;  %2261 = vmatmul.mubr.msk.bf16.vlgmr.msra.gmra.mrb[8].mxu1 %vm382_vm2, %v709_v60  ;;  %v3083_v45 = vmul.f32 %v2433_v1, %v3072_v29 }
 0x3c6   :  { %2438 = vpow2.f32 %v429_v24  ;;  %v656_v13 = vsub.f32 %v2912_v19, %v642_v38  ;;  %2275 = vmatpush3.bf16.msra.mxu0 %v980_v0  ;;  %2285 = vmatpush3.bf16.msra.mxu1 %v2707_v25  ;;  %v916_v24 = vsub.f32 %v2819_v59, %v2991_v8 }
 0x3c7   :  { %2286 = vmatprep.subr.bf16.mxu1 %v2700_v20 }
 0x3c8   :  { %v2435_v39 = vpop.eup %2434  ;;  %v668_v43 = vmul.f32 1.442695, %v656_v13  ;;  %694 = vadd.xlane.f32.xlu0 %v693_v36 }
 0x3c9   :  { %v645_v19 = vpop.xlane.xlu1 %644  ;;  %v3086_v62 = vmul.f32 %v2435_v39, %v3080_v51  ;;  %v927_v39 = vmul.f32 1.442695, %v916_v24 }
 0x3ca   :  { %v657_v25 = vsub.f32 %v2918_v35, %v645_v19  ;;  %2287 = vmatpush3.bf16.msra.mxu1 %v2700_v20  ;;  %2440 = vpow2.f32 %v668_v43  ;;  %v3098_v35 = vld [vmem:[%s3455_s1 + $0x30] sm:$0xff] }
 0x3cb   :  { %v465_v57 = vpack.c.bf16 %v3086_v62, %v3083_v45  ;;  %2288 = vmatprep.subr.bf16.mxu1 %v2735_v41 }
 0x3cc   :  { %v670_v47 = vmul.f32 1.442695, %v657_v25  ;;  %v2437_v50 = vpop.eup %2436 }
 0x3cd   :  { %2248 = vmatprep.mubr.msk.bf16.mxu0 %vm382_vm2, %v465_v57  ;;  %v648_v23 = vpop.xlane.xlu1 %647  ;;  %v3107_v63 = vmul.f32 %v2437_v50, %v3098_v35  ;;  %v1173_v57 = vsub.f32 %v2836_v33, %v2997_v16 }
 0x3ce   :  { %2442 = vpow2.f32 %v670_v47  ;;  %v658_v5 = vsub.f32 %v2924_v52, %v648_v23  ;;  %2289 = vmatpush3.bf16.msra.mxu1 %v2735_v41 }
 0x3d0   :  { %v2439_v20 = vpop.eup %2438  ;;  %v672_v27 = vmul.f32 1.442695, %v658_v5 }
 0x3d1   :  { %v651_v14 = vpop.xlane.xlu1 %650  ;;  %v3110_v52 = vmul.f32 %v2439_v20, %v3104_v54 }
 0x3d2   :  { %v659_v56 = vsub.f32 %v2932_v6, %v651_v14  ;;  %2444 = vpow2.f32 %v672_v27  ;;  %v1171_v6 = vsub.f32 %v2827_v21, %v2994_v3 }
 0x3d3   :  { %v466_v0 = vpack.c.bf16 %v3110_v52, %v3107_v63 }
 0x3d4   :  { %v674_v41 = vmul.f32 1.442695, %v659_v56  ;;  %v2441_v60 = vpop.eup %2440  ;;  %v1180_v25 = vmul.f32 1.442695, %v1171_v6 }
 0x3d5   :  { %2249 = vmatmul.mubr.msk.bf16.gmra.mrb[12].mxu0 %vm382_vm2, %v466_v0  ;;  %v891_v10 = vpop.xlane.xlu1 %890  ;;  %v3122_v36 = vmul.f32 %v2441_v60, %v3072_v29 }
 0x3d6   :  { %2446 = vpow2.f32 %v674_v41  ;;  %v913_v38 = vsub.f32 %v2938_v46, %v891_v10 }
 0x3d8   :  { %v2443_v1 = vpop.eup %2442  ;;  %v921_v13 = vmul.f32 1.442695, %v913_v38 }
 0x3d9   :  { %v894_v43 = vpop.xlane.xlu1 %893  ;;  %v3125_v19 = vmul.f32 %v2443_v1, %v3080_v51  ;;  %v920_v1 = vsub.f32 %v2864_v48, %v3023_v11  ;;  %v1175_v48 = vsub.f32 %v2876_v32, %v3044_v7  ;;  %v1177_v7 = vsub.f32 %v2886_v40, %v3054_v30 }
 0x3da   :  { %2448 = vpow2.f32 %v921_v13  ;;  %v914_v59 = vsub.f32 %v2944_v61, %v894_v43  ;;  %v1184_v61 = vmul.f32 1.442695, %v1173_v57 }
 0x3db   :  { %v710_v8 = vpack.c.bf16 %v3125_v19, %v3122_v36  ;;  %2450 = vpow2.f32 %v927_v39  ;;  %v1188_v32 = vmul.f32 1.442695, %v1175_v48  ;;  %v1192_v40 = vmul.f32 1.442695, %v1177_v7 }
 0x3dc   :  { %v923_v46 = vmul.f32 1.442695, %v914_v59  ;;  %v2445_v3 = vpop.eup %2444  ;;  %v448_v7 = vsel %vm382_vm2, %v3041_v31, 0.0 }
 0x3dd   :  { %2264 = vmatprep.mubr.msk.bf16.mxu1 %vm382_vm2, %v710_v8  ;;  %v897_v21 = vpop.xlane.xlu1 %896  ;;  %v3135_v20 = vmul.f32 %v2445_v3, %v3098_v35 }
 0x3de   :  { %2452 = vpow2.f32 %v923_v46  ;;  %v915_v47 = vsub.f32 %v2950_v17, %v897_v21  ;;  %v918_v17 = vsub.f32 %v2854_v12, %v3001_v53  ;;  %v935_v46 = vmul.f32 1.442695, %v920_v1 }
 0x3df   :  { %2454 = vpow2.f32 %v1180_v25 }
 0x3e0   :  { %v2447_v23 = vpop.eup %2446  ;;  %v925_v50 = vmul.f32 1.442695, %v915_v47  ;;  %v931_v38 = vmul.f32 1.442695, %v918_v17 }
 0x3e1   :  { %v1148_v5 = vpop.xlane.xlu1 %1147  ;;  %v3138_v27 = vmul.f32 %v2447_v23, %v3104_v54 }
 0x3e2   :  { %2456 = vpow2.f32 %v925_v50  ;;  %v1170_v33 = vsub.f32 %v2956_v22, %v1148_v5 }
 0x3e3   :  { %v711_v16 = vpack.c.bf16 %v3138_v27, %v3135_v20  ;;  %2458 = vpow2.f32 %v1184_v61 }
 0x3e4   :  { %v2449_v14 = vpop.eup %2448  ;;  %v1178_v56 = vmul.f32 1.442695, %v1170_v33 }
 0x3e5   :  { %2265 = vmatmul.mubr.msk.bf16.gmra.mrb[12].mxu1 %vm382_vm2, %v711_v16  ;;  %v1154_v0 = vpop.xlane.xlu1 %1153  ;;  %v937_v41 = vmul.f32 %v2449_v14, %v3006_v26  ;;  %v2451_v10 = vpop.eup %2450 }
 0x3e6   :  { %2460 = vpow2.f32 %v1178_v56  ;;  %v1172_v24 = vsub.f32 %v2962_v9, %v1154_v0  ;;  %v940_v59 = vmul.f32 %v2451_v10, %v3035_v34 }
 0x3e7   :  { %v945_v22 = vsel %vm382_vm2, %v937_v41, 0.0 }
 0x3e8   :  { %v2453_v60 = vpop.eup %2452  ;;  %v1182_v13 = vmul.f32 1.442695, %v1172_v24  ;;  %946 = vadd.xlane.f32.xlu1 %v945_v22  ;;  %v954_v3 = vsel %vm382_vm2, %v940_v59, 0.0 }
 0x3e9   :  { %v903_v12 = vpop.xlane.xlu1 %902  ;;  %v938_v53 = vmul.f32 %v2453_v60, %v3011_v42  ;;  %v2455_v6 = vpop.eup %2454 }
 0x3ea   :  { %2462 = vpow2.f32 %v1182_v13  ;;  %v917_v39 = vsub.f32 %v2968_v37, %v903_v12  ;;  %v1195_v50 = vmul.f32 %v2455_v6, %v3011_v42 }
 0x3eb   :  { %v948_v43 = vsel %vm382_vm2, %v938_v53, 0.0  ;;  %v969_v9 = vpack.c.bf16 %v938_v53, %v937_v41  ;;  %2464 = vpow2.f32 %v931_v38 }
 0x3ec   :  { %v2457_v8 = vpop.eup %2456  ;;  %v929_v11 = vmul.f32 1.442695, %v917_v39  ;;  %949 = vadd.xlane.f32.xlu0 %v948_v43  ;;  %v1205_v14 = vsel %vm382_vm2, %v1195_v50, 0.0 }
 0x3ed   :  { %2276 = vmatprep.mubr.msk.bf16.mxu0 %vm382_vm2, %v969_v9  ;;  %v909_v25 = vpop.xlane.xlu1 %908  ;;  %v939_v57 = vmul.f32 %v2457_v8, %v3030_v2  ;;  %v2459_v21 = vpop.eup %2458 }
 0x3ee   :  { %2466 = vpow2.f32 %v929_v11  ;;  %v919_v37 = vsub.f32 %v2974_v28, %v909_v25  ;;  %v1197_v56 = vmul.f32 %v2459_v21, %v3035_v34 }
 0x3ef   :  { %v951_v47 = vsel %vm382_vm2, %v939_v57, 0.0  ;;  %v970_v23 = vpack.c.bf16 %v940_v59, %v939_v57  ;;  %2468 = vpow2.f32 %v935_v46 }
 0x3f0   :  { %v2461_v61 = vpop.eup %2460  ;;  %v933_v5 = vmul.f32 1.442695, %v919_v37  ;;  %955 = vadd.xlane.f32.xlu0 %v954_v3  ;;  %952 = vadd.xlane.f32.xlu1 %v951_v47  ;;  %v1211_v10 = vsel %vm382_vm2, %v1197_v56, 0.0 }
 0x3f1   :  { %2277 = vmatmul.mubr.msk.bf16.vlgmr.msra.gmra.mrb[16].mxu0 %vm382_vm2, %v970_v23  ;;  %v1160_v28 = vpop.xlane.xlu1 %1159  ;;  %v1194_v33 = vmul.f32 %v2461_v61, %v3006_v26 }
 0x3f2   :  { %2470 = vpow2.f32 %v933_v5  ;;  %v1174_v16 = vsub.f32 %v2980_v44, %v1160_v28  ;;  %v445_v5 = vsel %vm382_vm2, %v3038_v49, 0.0  ;;  %v454_v28 = vsel %vm382_vm2, %v3086_v62, 0.0 }
 0x3f3   :  { %v1202_v42 = vsel %vm382_vm2, %v1194_v33, 0.0  ;;  %v1226_v17 = vpack.c.bf16 %v1195_v50, %v1194_v33  ;;  %2472 = vpow2.f32 %v1188_v32  ;;  %v439_v32 = vsel %vm382_vm2, %v3016_v4, 0.0 }
 0x3f4   :  { %v2463_v0 = vpop.eup %2462  ;;  %v1186_v30 = vmul.f32 1.442695, %v1174_v16  ;;  %1206 = vadd.xlane.f32.xlu0 %v1205_v14  ;;  %1203 = vadd.xlane.f32.xlu1 %v1202_v42  ;;  %v451_v33 = vsel %vm382_vm2, %v3083_v45, 0.0  ;;  %v460_v4 = vsel %vm382_vm2, %v3110_v52, 0.0 }
 0x3f5   :  { %2292 = vmatprep.mubr.msk.bf16.mxu1 %vm382_vm2, %v1226_v17  ;;  %v1166_v41 = vpop.xlane.xlu1 %1165  ;;  %v1196_v26 = vmul.f32 %v2463_v0, %v3030_v2  ;;  %v2465_v24 = vpop.eup %2464  ;;  %v696_v2 = vsel %vm382_vm2, %v3122_v36, 0.0  ;;  %v702_v36 = vsel %vm382_vm2, %v3135_v20, 0.0 }
 0x3f6   :  { %2474 = vpow2.f32 %v1186_v30  ;;  %v1176_v44 = vsub.f32 %v2984_v55, %v1166_v41  ;;  %v942_v13 = vmul.f32 %v2465_v24, %v3080_v51  ;;  %v699_v55 = vsel %vm382_vm2, %v3125_v19, 0.0 }
 0x3f7   :  { %v1208_v22 = vsel %vm382_vm2, %v1196_v26, 0.0  ;;  %2476 = vpow2.f32 %v1192_v40  ;;  %v1227_v6 = vpack.c.bf16 %v1197_v56, %v1196_v26  ;;  %v705_v19 = vsel %vm382_vm2, %v3138_v27, 0.0 }
 0x3f8   :  { %v2467_v34 = vpop.eup %2466  ;;  %v1190_v60 = vmul.f32 1.442695, %v1176_v44  ;;  %1212 = vadd.xlane.f32.xlu0 %v1211_v10  ;;  %1209 = vadd.xlane.f32.xlu1 %v1208_v22  ;;  %v960_v57 = vsel %vm382_vm2, %v942_v13, 0.0 }
 0x3f9   :  { %v1237_v38 = vpop.permute.xlu1 %1236  ;;  %v941_v1 = vmul.f32 %v2467_v34, %v3072_v29  ;;  %v2469_v12 = vpop.eup %2468 }
 0x3fa   :  { %2478 = vpow2.f32 %v1190_v60  ;;  %2290 = vmatprep.subr.bf16.mxu1 %v1237_v38  ;;  %v944_v9 = vmul.f32 %v2469_v12, %v3104_v54 }
 0x3fb   :  { %2291 = vmatpush3.bf16.msra.mxu1 %v1237_v38  ;;  %v971_v53 = vpack.c.bf16 %v942_v13, %v941_v1  ;;  %v957_v37 = vsel %vm382_vm2, %v941_v1, 0.0 }
 0x3fc   :  { %v2471_v39 = vpop.eup %2470  ;;  %700 = vadd.xlane.f32.xlu0 %v699_v55  ;;  %697 = vadd.xlane.f32.xlu1 %v696_v2  ;;  %v966_v47 = vsel %vm382_vm2, %v944_v9, 0.0 }
 0x3fd   :  { %2280 = vmatprep.mubr.msk.bf16.mxu0 %vm382_vm2, %v971_v53  ;;  %v943_v43 = vmul.f32 %v2471_v39, %v3098_v35  ;;  %v2473_v59 = vpop.eup %2472 }
 0x3fe   :  { %2293 = vmatmul.mubr.msk.bf16.vlgmr.msra.gmra.mrb[16].mxu1 %vm382_vm2, %v1227_v6  ;;  %v1199_v11 = vmul.f32 %v2473_v59, %v3080_v51 }
 0x3ff   :  { %v972_v8 = vpack.c.bf16 %v944_v9, %v943_v43 }
 0x400   :  { %v2475_v46 = vpop.eup %2474  ;;  %706 = vadd.xlane.f32.xlu0 %v705_v19  ;;  %703 = vadd.xlane.f32.xlu1 %v702_v36  ;;  %v1217_v23 = vsel %vm382_vm2, %v1199_v11, 0.0 }
 0x401   :  { %2281 = vmatmul.mubr.msk.bf16.gmra.mrb[20].mxu0 %vm382_vm2, %v972_v8  ;;  %v1198_v48 = vmul.f32 %v2475_v46, %v3072_v29  ;;  %v2477_v25 = vpop.eup %2476  ;;  %v963_v29 = vsel %vm382_vm2, %v943_v43, 0.0 }
 0x402   :  { %v1201_v3 = vmul.f32 %v2477_v25, %v3104_v54  ;;  %v442_v54 = vsel %vm382_vm2, %v3019_v58, 0.0  ;;  %v457_v58 = vsel %vm382_vm2, %v3107_v63, 0.0 }
 0x403   :  { %v1228_v21 = vpack.c.bf16 %v1199_v11, %v1198_v48  ;;  %v1214_v50 = vsel %vm382_vm2, %v1198_v48, 0.0 }
 0x404   :  { %v2479_v27 = vpop.eup %2478  ;;  %961 = vadd.xlane.f32.xlu0 %v960_v57  ;;  %958 = vadd.xlane.f32.xlu1 %v957_v37  ;;  %v1223_v61 = vsel %vm382_vm2, %v1201_v3, 0.0 }
 0x405   :  { %2296 = vmatprep.mubr.msk.bf16.mxu1 %vm382_vm2, %v1228_v21  ;;  %v1200_v20 = vmul.f32 %v2479_v27, %v3098_v35 }
 0x407   :  { %v1229_v51 = vpack.c.bf16 %v1201_v3, %v1200_v20  ;;  %v1220_v35 = vsel %vm382_vm2, %v1200_v20, 0.0 }
 0x408   :  { %967 = vadd.xlane.f32.xlu0 %v966_v47  ;;  %964 = vadd.xlane.f32.xlu1 %v963_v29 }
 0x409   :  { %2297 = vmatmul.mubr.msk.bf16.gmra.mrb[20].mxu1 %vm382_vm2, %v1229_v51 }
 0x40c   :  { %1218 = vadd.xlane.f32.xlu0 %v1217_v23  ;;  %1215 = vadd.xlane.f32.xlu1 %v1214_v50 }
 0x410   :  { %1224 = vadd.xlane.f32.xlu0 %v1223_v61  ;;  %1221 = vadd.xlane.f32.xlu1 %v1220_v35 }
 0x414   :  { %443 = vadd.xlane.f32.xlu0 %v442_v54  ;;  %440 = vadd.xlane.f32.xlu1 %v439_v32 }
 0x418   :  { %449 = vadd.xlane.f32.xlu0 %v448_v7  ;;  %446 = vadd.xlane.f32.xlu1 %v445_v5 }
 0x41c   :  { %455 = vadd.xlane.f32.xlu0 %v454_v28  ;;  %452 = vadd.xlane.f32.xlu1 %v451_v33 }
 0x420   :  { %461 = vadd.xlane.f32.xlu0 %v460_v4  ;;  %458 = vadd.xlane.f32.xlu1 %v457_v58 }
 0x449   :  { %v686_v31 = vpop.xlane.xlu0 %685 }
 0x44d   :  { %v689_v16 = vpop.xlane.xlu1 %688 }
 0x451   :  { %v692_v49 = vpop.xlane.xlu0 %691 }
 0x452   :  { %2480 = vrcp.f32 %v692_v49 }
 0x453   :  { %2482 = vrcp.f32 %v689_v16 }
 0x454   :  { %2484 = vrcp.f32 %v686_v31 }
 0x455   :  { %v695_v14 = vpop.xlane.xlu0 %694 }
 0x456   :  { %2486 = vrcp.f32 %v695_v14 }
 0x45c   :  { %v2481_v40 = vpop.eup %2480 }
 0x45d   :  { %v2483_v22 = vpop.eup %2482 }
 0x45e   :  { %v2485_v60 = vpop.eup %2484 }
 0x460   :  { %v2487_v12 = vpop.eup %2486 }
 0x475   :  { %v3223_v62 = vpop.xlane.xlu1 %946 }
 0x479   :  { %v3227_v45 = vpop.xlane.xlu0 %949 }
 0x47d   :  { %v953_v63 = vpop.xlane.xlu1 %952  ;;  %v956_v0 = vpop.xlane.xlu0 %955 }
 0x481   :  { %v3233_v30 = vpop.xlane.xlu1 %1203  ;;  %v3235_v44 = vpop.xlane.xlu0 %1206 }
 0x485   :  { %v1210_v13 = vpop.xlane.xlu1 %1209  ;;  %v1213_v55 = vpop.xlane.xlu0 %1212 }
 0x489   :  { %v698_v53 = vpop.xlane.xlu1 %697  ;;  %v701_v39 = vpop.xlane.xlu0 %700 }
 0x48c   :  { %v3221_v42 = vpop.f32.mrb[8].mxu0 }
 0x48d   :  { %v3225_v17 = vpop.f32.mrb[9].mxu0  ;;  %v704_v59 = vpop.xlane.xlu1 %703 }
 0x48e   :  { %v3229_v56 = vpop.f32.mrb[10].mxu0  ;;  %v707_v36 = vpop.xlane.xlu0 %706  ;;  %2488 = vrcp.f32 %v704_v59 }
 0x48f   :  { %v3231_v52 = vpop.f32.mrb[11].mxu0  ;;  %2490 = vrcp.f32 %v707_v36 }
 0x490   :  { %2492 = vrcp.f32 %v698_v53 }
 0x491   :  { %2494 = vrcp.f32 %v701_v39  ;;  %v959_v7 = vpop.xlane.xlu1 %958 }
 0x492   :  { %2496 = vrcp.f32 %v953_v63  ;;  %v962_v5 = vpop.xlane.xlu0 %961 }
 0x493   :  { %2498 = vrcp.f32 %v956_v0 }
 0x494   :  { %2500 = vrcp.f32 %v1210_v13 }
 0x495   :  { %2502 = vrcp.f32 %v1213_v55  ;;  %v965_v28 = vpop.xlane.xlu1 %964 }
 0x496   :  { %2504 = vrcp.f32 %v3223_v62  ;;  %v968_v58 = vpop.xlane.xlu0 %967 }
 0x497   :  { %2506 = vrcp.f32 %v3227_v45 }
 0x498   :  { %v2262_v41 = vpop.f32.mrb[8].mxu1  ;;  %v2489_v8 = vpop.eup %2488  ;;  %2508 = vrcp.f32 %v3233_v30 }
 0x499   :  { %v815_v26 = vmul.f32 %v2481_v40, %v2262_v41  ;;  %v774_v24 = vpop.f32.mrb[9].mxu1  ;;  %v2491_v25 = vpop.eup %2490  ;;  %2510 = vrcp.f32 %v3235_v44 }
 0x49a   :  { %v2263_v10 = vpop.f32.mrb[10].mxu1  ;;  %v813_v1 = vmul.f32 %v2485_v60, %v774_v24  ;;  %v2493_v27 = vpop.eup %2492  ;;  %2512 = vrcp.f32 %v965_v28  ;;  %v2414_v28 = vld [vmem:[%s3457_s6 + $0x30] sm:$0xff]  }
 0x49b   :  { %v777_v34 = vpop.f32.mrb[11].mxu1  ;;  %1347 = vrot.lane.b32.xlu1 %v815_v26, %s2608_s14  ;;  %v816_v2 = vmul.f32 %v2487_v12, %v2263_v10  ;;  %v2495_v3 = vpop.eup %2494  ;;  %2514 = vrcp.f32 %v968_v58 }
 0x49c   :  { %v814_v38 = vmul.f32 %v2483_v22, %v777_v34  ;;  %v2497_v29 = vpop.eup %2496  ;;  %v1216_v30 = vpop.xlane.xlu1 %1215  ;;  %2516 = vrcp.f32 %v959_v7  ;;  %v2412_v7 = vld [vmem:[%s3457_s6 + $0x20] sm:$0xff]  }
 0x49d   :  { %v2499_v61 = vpop.eup %2498  ;;  %v1219_v10 = vpop.xlane.xlu0 %1218  ;;  %2518 = vrcp.f32 %v962_v5  ;;  %v2413_v5 = vld [vmem:[%s3457_s6 + $0x28] sm:$0xff]  }
 0x49e   :  { %1345 = vrot.lane.b32.xlu0 %v814_v38, %s2608_s14  ;;  %v2501_v33 = vpop.eup %2500  ;;  %2520 = vrcp.f32 %v1216_v30 }
 0x49f   :  { %1343 = vrot.lane.b32.xlu1 %v813_v1, %s2608_s14  ;;  %v2503_v16 = vpop.eup %2502  ;;  %2522 = vrcp.f32 %v1219_v10 }
 0x4a0   :  { %v2505_v62 = vpop.eup %2504  ;;  %v1222_v1 = vpop.xlane.xlu1 %1221 }
 0x4a1   :  { %v2507_v24 = vpop.eup %2506  ;;  %v1225_v53 = vpop.xlane.xlu0 %1224  ;;  %2524 = vrcp.f32 %v1222_v1 }
 0x4a2   :  { %v2509_v34 = vpop.eup %2508  ;;  %2526 = vrcp.f32 %v1225_v53 }
 0x4a3   :  { %1349 = vrot.lane.b32.xlu1 %v816_v2, %s2608_s14  ;;  %v2511_v38 = vpop.eup %2510 }
 0x4a4   :  { %v2513_v55 = vpop.eup %2512 }
 0x4a5   :  { %v2515_v36 = vpop.eup %2514  ;;  %v444_v58 = vpop.xlane.xlu0 %443 }
 0x4a8   :  { %v3241_v6 = vpop.f32.mrb[12].mxu0 }
 0x4a9   :  { %v3243_v43 = vpop.f32.mrb[13].mxu0 }
 0x4aa   :  { %v3245_v9 = vpop.f32.mrb[14].mxu0 }
 0x4ab   :  { %v3247_v19 = vpop.f32.mrb[15].mxu0 }
 0x4b8   :  { %v2266_v46 = vpop.f32.mrb[12].mxu1 }
 0x4b9   :  { %v819_v48 = vmul.f32 %v2489_v8, %v2266_v46  ;;  %v790_v11 = vpop.f32.mrb[13].mxu1 }
 0x4ba   :  { %v2267_v57 = vpop.f32.mrb[14].mxu1  ;;  %v817_v20 = vmul.f32 %v2493_v27, %v790_v11  ;;  %v2406_v27 = vld [vmem:[%s3456_s5] sm:$0xff]  }
 0x4bb   :  { %v820_v37 = vmul.f32 %v2491_v25, %v2267_v57  ;;  %v793_v21 = vpop.f32.mrb[15].mxu1  ;;  %1355 = vrot.lane.b32.xlu0 %v819_v48, %s2608_s14  ;;  %v2517_v48 = vpop.eup %2516  ;;  %2300 = vmatprep.subr.bf16.mxu0 %v2406_v27 }
 0x4bc   :  { %v818_v47 = vmul.f32 %v2495_v3, %v793_v21  ;;  %v2519_v25 = vpop.eup %2518  ;;  %2301 = vmatpush3.bf16.msra.mxu0 %v2406_v27 }
 0x4bd   :  { %1357 = vrot.lane.b32.xlu1 %v820_v37, %s2608_s14  ;;  %v2521_v37 = vpop.eup %2520 }
 0x4bf   :  { %1351 = vrot.lane.b32.xlu0 %v817_v20, %s2608_s14  ;;  %v2523_v20 = vpop.eup %2522 }
 0x4c1   :  { %1353 = vrot.lane.b32.xlu1 %v818_v47, %s2608_s14  ;;  %v2525_v47 = vpop.eup %2524 }
 0x4c4   :  { %v2278_v51 = vpop.f32.mrb[16].mxu0 }
 0x4c5   :  { %v1072_v23 = vmul.f32 %v2497_v29, %v2278_v51  ;;  %v1031_v50 = vpop.f32.mrb[17].mxu0  ;;  %v2527_v51 = vpop.eup %2526 }
 0x4c6   :  { %v2279_v35 = vpop.f32.mrb[18].mxu0  ;;  %v1070_v41 = vmul.f32 %v2505_v62, %v1031_v50  ;;  %v2407_v50 = vld [vmem:[%s3456_s5 + $0x8] sm:$0xff]  }
 0x4c7   :  { %v1073_v54 = vmul.f32 %v2499_v61, %v2279_v35  ;;  %v1034_v32 = vpop.f32.mrb[19].mxu0  ;;  %1379 = vrot.lane.b32.xlu0 %v1072_v23, %s2609_s2  ;;  %2302 = vmatprep.subr.bf16.mxu0 %v2407_v50  ;;  %v2408_v61 = vld [vmem:[%s3457_s6] sm:$0xff]   ;;  %v2409_v35 = vld [vmem:[%s3457_s6 + $0x8] sm:$0xff]  }
 0x4c8   :  { %v1071_v22 = vmul.f32 %v2507_v24, %v1034_v32  ;;  %2303 = vmatpush3.bf16.msra.mxu0 %v2407_v50  ;;  %2312 = vmatprep.subr.bf16.mxu1 %v2408_v61  ;;  %v2411_v32 = vld [vmem:[%s3457_s6 + $0x18] sm:$0xff]  }
 0x4c9   :  { %1381 = vrot.lane.b32.xlu1 %v1073_v54, %s2609_s2  ;;  %2313 = vmatpush3.bf16.msra.mxu1 %v2408_v61  ;;  %v2410_v54 = vld [vmem:[%s3457_s6 + $0x10] sm:$0xff]  }
 0x4ca   :  { %2314 = vmatprep.subr.bf16.mxu1 %v2409_v35 }
 0x4cd   :  { %2315 = vmatpush3.bf16.msra.mxu1 %v2409_v35 }
 0x4ce   :  { %2316 = vmatprep.subr.bf16.mxu1 %v2410_v54 }
 0x4d1   :  { %v2294_v4 = vpop.f32.mrb[16].mxu1  ;;  %2317 = vmatpush3.bf16.msra.mxu1 %v2410_v54 }
 0x4d2   :  { %v1329_v31 = vmul.f32 %v2501_v33, %v2294_v4  ;;  %v1288_v49 = vpop.f32.mrb[17].mxu1  ;;  %2318 = vmatprep.subr.bf16.mxu1 %v2411_v32  ;;  %v441_v33 = vpop.xlane.xlu1 %440 }
 0x4d3   :  { %v2295_v14 = vpop.f32.mrb[18].mxu1  ;;  %v1327_v60 = vmul.f32 %v2509_v34, %v1288_v49  ;;  %v450_v49 = vpop.xlane.xlu0 %449 }
 0x4d4   :  { %v1330_v63 = vmul.f32 %v2503_v16, %v2295_v14  ;;  %v2282_v0 = vpop.f32.mrb[20].mxu0  ;;  %v1291_v40 = vpop.f32.mrb[19].mxu1  ;;  %1411 = vrot.lane.b32.xlu0 %v1329_v31, %s2610_s15 }
 0x4d5   :  { %v1047_v45 = vpop.f32.mrb[21].mxu0  ;;  %v1328_v13 = vmul.f32 %v2511_v38, %v1291_v40  ;;  %v1076_v39 = vmul.f32 %v2513_v55, %v2282_v0  ;;  %2319 = vmatpush3.bf16.msra.mxu1 %v2411_v32 }
 0x4d6   :  { %v2283_v26 = vpop.f32.mrb[22].mxu0  ;;  %1413 = vrot.lane.b32.xlu1 %v1330_v63, %s2610_s15  ;;  %v1074_v11 = vmul.f32 %v2517_v48, %v1047_v45  ;;  %2320 = vmatprep.subr.bf16.mxu1 %v2412_v7  ;;  %v447_v4 = vpop.xlane.xlu1 %446 }
 0x4d7   :  { %v1050_v44 = vpop.f32.mrb[23].mxu0  ;;  %v1077_v46 = vmul.f32 %v2515_v36, %v2283_v26  ;;  %v456_v14 = vpop.xlane.xlu0 %455  ;;  %2528 = vrcp.f32 %v447_v4 }
 0x4d8   :  { %1375 = vrot.lane.b32.xlu0 %v1070_v41, %s2609_s2  ;;  %v1075_v57 = vmul.f32 %v2519_v25, %v1050_v44  ;;  %2530 = vrcp.f32 %v450_v49 }
 0x4d9   :  { %2321 = vmatpush3.bf16.msra.mxu1 %v2412_v7  ;;  %2532 = vrcp.f32 %v441_v33 }
 0x4da   :  { %1377 = vrot.lane.b32.xlu1 %v1071_v22, %s2609_s2  ;;  %2322 = vmatprep.subr.bf16.mxu1 %v2413_v5  ;;  %v453_v31 = vpop.xlane.xlu1 %452  ;;  %2534 = vrcp.f32 %v444_v58 }
 0x4db   :  { %v462_v0 = vpop.xlane.xlu0 %461  ;;  %2536 = vrcp.f32 %v453_v31 }
 0x4dc   :  { %v2298_v12 = vpop.f32.mrb[20].mxu1  ;;  %1407 = vrot.lane.b32.xlu0 %v1327_v60, %s2610_s15  ;;  %2538 = vrcp.f32 %v456_v14 }
 0x4dd   :  { %v1304_v2 = vpop.f32.mrb[21].mxu1  ;;  %v1333_v29 = vmul.f32 %v2525_v47, %v2298_v12  ;;  %2323 = vmatpush3.bf16.msra.mxu1 %v2413_v5  ;;  %2540 = vrcp.f32 %v462_v0 }
 0x4de   :  { %1409 = vrot.lane.b32.xlu1 %v1328_v13, %s2610_s15  ;;  %v2299_v59 = vpop.f32.mrb[22].mxu1  ;;  %v1331_v21 = vmul.f32 %v2521_v37, %v1304_v2  ;;  %2324 = vmatprep.subr.bf16.mxu1 %v2414_v28  ;;  %v459_v16 = vpop.xlane.xlu1 %458  ;;  %v3314_v13 = vld [vmem:[%s3458_s4] ss:$0 sm:$0xff] }
 0x4df   :  { %v1307_v8 = vpop.f32.mrb[23].mxu1  ;;  %v1334_v23 = vmul.f32 %v2527_v51, %v2299_v59  ;;  %2542 = vrcp.f32 %v459_v16 }
 0x4e0   :  { %1387 = vrot.lane.b32.xlu0 %v1076_v39, %s2609_s2  ;;  %v1332_v3 = vmul.f32 %v2523_v20, %v1307_v8 }
 0x4e1   :  { %2325 = vmatpush3.bf16.msra.mxu1 %v2414_v28  ;;  %v2529_v24 = vpop.eup %2528 }
 0x4e2   :  { %1389 = vrot.lane.b32.xlu1 %v1077_v46, %s2609_s2  ;;  %v2531_v10 = vpop.eup %2530  ;;  %v554_v34 = vmul.f32 %v2529_v24, %v3221_v42 }
 0x4e3   :  { %v555_v1 = vmul.f32 %v2531_v10, %v3229_v56  ;;  %v2533_v39 = vpop.eup %2532 }
 0x4e4   :  { %1383 = vrot.lane.b32.xlu0 %v1074_v11, %s2609_s2  ;;  %v2535_v8 = vpop.eup %2534  ;;  %v552_v25 = vmul.f32 %v2533_v39, %v3225_v17 }
 0x4e5   :  { %v553_v27 = vmul.f32 %v2535_v8, %v3231_v52  ;;  %v2537_v7 = vpop.eup %2536 }
 0x4e6   :  { %1385 = vrot.lane.b32.xlu1 %v1075_v57, %s2609_s2  ;;  %v2539_v4 = vpop.eup %2538  ;;  %v556_v14 = vmul.f32 %v2537_v7, %v3243_v43 }
 0x4e7   :  { %v2541_v58 = vpop.eup %2540 }
 0x4e8   :  { %1415 = vrot.lane.b32.xlu0 %v1331_v21, %s2610_s15  ;;  %v559_v10 = vmul.f32 %v2541_v58, %v3245_v9 }
 0x4e9   :  { %v2543_v16 = vpop.eup %2542 }
 0x4ea   :  { %1417 = vrot.lane.b32.xlu1 %v1332_v3, %s2610_s15 }
 0x4ec   :  { %1419 = vrot.lane.b32.xlu0 %v1333_v29, %s2610_s15 }
 0x4ee   :  { %1421 = vrot.lane.b32.xlu1 %v1334_v23, %s2610_s15 }
 0x50d   :  { %v1348_v63 = vpop.permute.xlu1 %1347 }
 0x50e   :  { %v1434_v38 = vsel %vm1431_vm9, %v554_v34, %v1348_v63 }
 0x510   :  { %v1346_v62 = vpop.permute.xlu0 %1345 }
 0x511   :  { %v1344_v40 = vpop.permute.xlu1 %1343  ;;  %v1433_v51 = vsel %vm1431_vm9, %v553_v27, %v1346_v62 }
 0x512   :  { %v1432_v20 = vsel %vm1431_vm9, %v552_v25, %v1344_v40  ;;  %v557_v40 = vmul.f32 %v2539_v4, %v3247_v19 }
 0x515   :  { %v1350_v45 = vpop.permute.xlu1 %1349 }
 0x516   :  { %v1435_v2 = vsel %vm1431_vm9, %v555_v1, %v1350_v45 }
 0x52d   :  { %v3300_v30 = vpop.permute.xlu0 %1355 }
 0x52f   :  { %v3302_v41 = vpop.permute.xlu1 %1357 }
 0x531   :  { %v3304_v26 = vpop.permute.xlu0 %1351 }
 0x532   :  { %v1436_v62 = vsel %vm1431_vm9, %v556_v14, %v3304_v26 }
 0x533   :  { %v3306_v44 = vpop.permute.xlu1 %1353 }
 0x534   :  { %v1437_v43 = vsel %vm1431_vm9, %v557_v40, %v3306_v44 }
 0x539   :  { %v1380_v22 = vpop.permute.xlu0 %1379 }
 0x53a   :  { %v1442_v12 = vsel %vm74_vm0, %v1434_v38, %v1380_v22 }
 0x53b   :  { %v1382_v60 = vpop.permute.xlu1 %1381 }
 0x53c   :  { %v1443_v42 = vsel %vm74_vm0, %v1435_v2, %v1382_v60  ;;  %v558_v60 = vmul.f32 %v2543_v16, %v3241_v6  ;;  %v2415_v16 = vld [vmem:[%s3457_s6 + $0x38] sm:$0xff]   ;;  %s2611_s6 = smov 127  }
 0x53d   :  { %2326 = vmatprep.subr.bf16.mxu1 %v2415_v16 }
 0x53e   :  { %v1438_v9 = vsel %vm1431_vm9, %v558_v60, %v3300_v30  ;;  %2327 = vmatpush3.bf16.msra.mxu1 %v2415_v16 }
 0x546   :  { %v1412_v55 = vpop.permute.xlu0 %1411 }
 0x547   :  { %v1451_v53 = vsel %vm1448_vm10, %v1442_v12, %v1412_v55 }
 0x548   :  { %v3321_v59 = vadd.f32 %v3314_v13, %v1451_v53  ;;  %v1414_v36 = vpop.permute.xlu1 %1413 }
 0x549   :  { %v1452_v56 = vsel %vm1448_vm10, %v1443_v42, %v1414_v36 }
 0x54a   :  { %v1482_v46 = vmin.f32 %v3321_v59, 0.0  ;;  %v1467_v48 = vadd.f32 %v3314_v13, %v1452_v56  ;;  %v1376_v11 = vpop.permute.xlu0 %1375  ;;  %vm1474_vm11 = vcmp.gt.f32.partialorder %v3321_v59, 0.0  ;;  %v1439_v56 = vsel %vm1431_vm9, %v559_v10, %v3302_v41 }
 0x54b   :  { %v1440_v47 = vsel %vm74_vm0, %v1432_v20, %v1376_v11 }
 0x54c   :  { %v1492_v57 = vmul.f32 1.442695, %v1482_v46  ;;  %v1483_v37 = vmin.f32 %v1467_v48, 0.0  ;;  %v1378_v21 = vpop.permute.xlu1 %1377  ;;  %vm1475_vm12 = vcmp.gt.f32.partialorder %v1467_v48, 0.0 }
 0x54d   :  { %v1441_v17 = vsel %vm74_vm0, %v1433_v51, %v1378_v21 }
 0x54e   :  { %2544 = vpow2.f32 %v1492_v57  ;;  %v1494_v3 = vmul.f32 1.442695, %v1483_v37  ;;  %v1408_v29 = vpop.permute.xlu0 %1407 }
 0x54f   :  { %v1449_v23 = vsel %vm1448_vm10, %v1440_v47, %v1408_v29 }
 0x550   :  { %2546 = vpow2.f32 %v1494_v3  ;;  %v3334_v50 = vadd.f32 %v3314_v13, %v1449_v23  ;;  %v1410_v61 = vpop.permute.xlu1 %1409 }
 0x551   :  { %v1450_v52 = vsel %vm1448_vm10, %v1441_v17, %v1410_v61 }
 0x552   :  { %v1480_v35 = vmin.f32 %v3334_v50, 0.0  ;;  %v3339_v54 = vadd.f32 %v3314_v13, %v1450_v52  ;;  %v1388_v32 = vpop.permute.xlu0 %1387  ;;  %vm1472_vm13 = vcmp.gt.f32.partialorder %v3334_v50, 0.0 }
 0x553   :  { %v1446_v53 = vsel %vm74_vm0, %v1438_v9, %v1388_v32 }
 0x554   :  { %v1488_v5 = vmul.f32 1.442695, %v1480_v35  ;;  %v1481_v28 = vmin.f32 %v3339_v54, 0.0  ;;  %v1390_v33 = vpop.permute.xlu1 %1389  ;;  %vm1473_vm14 = vcmp.gt.f32.partialorder %v3339_v54, 0.0 }
 0x555   :  { %v1447_v30 = vsel %vm74_vm0, %v1439_v56, %v1390_v33 }
 0x556   :  { %2548 = vpow2.f32 %v1488_v5  ;;  %v1490_v31 = vmul.f32 1.442695, %v1481_v28  ;;  %v1384_v49 = vpop.permute.xlu0 %1383 }
 0x557   :  { %v1444_v22 = vsel %vm74_vm0, %v1436_v62, %v1384_v49 }
 0x558   :  { %v2545_v63 = vpop.eup %2544  ;;  %2550 = vpow2.f32 %v1490_v31  ;;  %v1386_v0 = vpop.permute.xlu1 %1385 }
 0x559   :  { %v2120_v45 = vadd.f32 -1.0, %v2545_v63  ;;  %v1445_v19 = vsel %vm74_vm0, %v1437_v43, %v1386_v0 }
 0x55a   :  { %v2547_v24 = vpop.eup %2546  ;;  %v1416_v34 = vpop.permute.xlu0 %1415 }
 0x55b   :  { %v2121_v38 = vadd.f32 -1.0, %v2547_v24  ;;  %v1453_v1 = vsel %vm1448_vm10, %v1444_v22, %v1416_v34  ;;  %v1514_v55 = vsel %vm1474_vm11, %v3321_v59, %v2120_v45 }
 0x55c   :  { %v1468_v26 = vadd.f32 %v3314_v13, %v1453_v1  ;;  %v1418_v12 = vpop.permute.xlu1 %1417 }
 0x55d   :  { %v1515_v6 = vsel %vm1475_vm12, %v1467_v48, %v2121_v38  ;;  %v1454_v2 = vsel %vm1448_vm10, %v1445_v19, %v1418_v12 }
 0x55e   :  { %v1521_v44 = vpack.c.bf16 %v1515_v6, %v1514_v55  ;;  %v1484_v39 = vmin.f32 %v1468_v26, 0.0  ;;  %v1469_v42 = vadd.f32 %v3314_v13, %v1454_v2  ;;  %v1420_v36 = vpop.permute.xlu0 %1419  ;;  %vm1476_vm0 = vcmp.gt.f32.partialorder %v1468_v26, 0.0 }
 0x55f   :  { %v1455_v8 = vsel %vm1448_vm10, %v1446_v53, %v1420_v36 }
 0x560   :  { %v2549_v46 = vpop.eup %2548  ;;  %v1496_v11 = vmul.f32 1.442695, %v1484_v39  ;;  %v1485_v59 = vmin.f32 %v1469_v42, 0.0  ;;  %v1470_v48 = vadd.f32 %v3314_v13, %v1455_v8  ;;  %v1422_v25 = vpop.permute.xlu1 %1421  ;;  %vm1477_vm15 = vcmp.gt.f32.partialorder %v1469_v42, 0.0 }
 0x561   :  { %v2118_v57 = vadd.f32 -1.0, %v2549_v46  ;;  %v1456_v37 = vsel %vm1448_vm10, %v1447_v30, %v1422_v25 }
 0x562   :  { %v2551_v21 = vpop.eup %2550  ;;  %2552 = vpow2.f32 %v1496_v11  ;;  %v1498_v27 = vmul.f32 1.442695, %v1485_v59  ;;  %v1486_v20 = vmin.f32 %v1470_v48, 0.0  ;;  %v1471_v41 = vadd.f32 %v3314_v13, %v1456_v37 }
 0x563   :  { %v2119_v3 = vadd.f32 -1.0, %v2551_v21  ;;  %v1512_v29 = vsel %vm1472_vm13, %v3334_v50, %v2118_v57  ;;  %vm1478_vm3 = vcmp.gt.f32.partialorder %v1470_v48, 0.0 }
 0x564   :  { %2554 = vpow2.f32 %v1498_v27  ;;  %v1500_v47 = vmul.f32 1.442695, %v1486_v20  ;;  %v1487_v23 = vmin.f32 %v1471_v41, 0.0  ;;  %vm1479_vm4 = vcmp.gt.f32.partialorder %v1471_v41, 0.0 }
 0x565   :  { %v1513_v51 = vsel %vm1473_vm14, %v3339_v54, %v2119_v3 }
 0x566   :  { %2556 = vpow2.f32 %v1500_v47  ;;  %v1520_v17 = vpack.c.bf16 %v1513_v51, %v1512_v29  ;;  %v1502_v61 = vmul.f32 1.442695, %v1487_v23 }
 0x568   :  { %2304 = vmatprep.mubr.msk.bf16.mxu0 %vm172_vm1, %v1520_v17  ;;  %2558 = vpow2.f32 %v1502_v61 }
 0x569   :  { %2305 = vmatmul.mubr.msk.bf16.vlgmr.msra.gmra.mrb[24].mxu0 %vm172_vm1, %v1521_v44 }
 0x56c   :  { %v2553_v13 = vpop.eup %2552 }
 0x56d   :  { %v2122_v52 = vadd.f32 -1.0, %v2553_v13 }
 0x56e   :  { %v2555_v35 = vpop.eup %2554 }
 0x56f   :  { %v2123_v32 = vadd.f32 -1.0, %v2555_v35  ;;  %v1516_v5 = vsel %vm1476_vm0, %v1468_v26, %v2122_v52 }
 0x570   :  { %v2557_v7 = vpop.eup %2556 }
 0x571   :  { %v1517_v50 = vsel %vm1477_vm15, %v1469_v42, %v2123_v32  ;;  %v2124_v28 = vadd.f32 -1.0, %v2557_v7 }
 0x572   :  { %v1522_v54 = vpack.c.bf16 %v1517_v50, %v1516_v5  ;;  %v2559_v33 = vpop.eup %2558 }
 0x573   :  { %v2125_v4 = vadd.f32 -1.0, %v2559_v33  ;;  %v1518_v58 = vsel %vm1478_vm3, %v1470_v48, %v2124_v28 }
 0x574   :  { %2308 = vmatprep.mubr.msk.bf16.mxu0 %vm172_vm1, %v1522_v54 }
 0x575   :  { %v1519_v31 = vsel %vm1479_vm4, %v1471_v41, %v2125_v4 }
 0x576   :  { %v1523_v49 = vpack.c.bf16 %v1519_v31, %v1518_v58 }
 0x578   :  { %2309 = vmatmul.mubr.msk.bf16.gmra.mrb[28].mxu0 %vm172_vm1, %v1523_v49 }
 0x63c   :  { %v2306_v14 = vpop.f32.mrb[24].mxu0 }
 0x63d   :  { %v1586_v63 = vpop.f32.mrb[25].mxu0 }
 0x63e   :  { %v2307_v0 = vpop.f32.mrb[26].mxu0 }
 0x63f   :  { %v1618_v40 = vpack.c.bf16 %v2307_v0, %v2306_v14  ;;  %v1589_v62 = vpop.f32.mrb[27].mxu0 }
 0x640   :  { %v1617_v45 = vpack.c.bf16 %v1589_v62, %v1586_v63 }
 0x642   :  { %2328 = vmatprep.mubr.bf16.mxu1 %v1617_v45  ;;  %2336 = vmatprep.subr.bf16.mxu0 %v1617_v45 }
 0x643   :  { %2329 = vmatmul.mubr.bf16.vlgmr.msra.gmra.mrb[24].mxu1 %v1618_v40  ;;  %2337 = vmatpush3.bf16.msra.mxu0 %v1617_v45 }
 0x644   :  { %2338 = vmatprep.subr.bf16.mxu0 %v1618_v40 }
 0x647   :  { %2339 = vmatpush3.bf16.msra.mxu0 %v1618_v40 }
 0x64b   :  { %v2310_v24 = vpop.f32.mrb[28].mxu0 }
 0x64c   :  { %v1602_v10 = vpop.f32.mrb[29].mxu0 }
 0x64d   :  { %v2311_v22 = vpop.f32.mrb[30].mxu0 }
 0x64e   :  { %v1620_v34 = vpack.c.bf16 %v2311_v22, %v2310_v24  ;;  %v1605_v60 = vpop.f32.mrb[31].mxu0 }
 0x64f   :  { %v1619_v43 = vpack.c.bf16 %v1605_v60, %v1602_v10 }
 0x651   :  { %2332 = vmatprep.mubr.bf16.mxu1 %v1619_v43  ;;  %2340 = vmatprep.subr.bf16.mxu0 %v1619_v43 }
 0x652   :  { %2333 = vmatmul.mubr.bf16.gmra.mrb[28].mxu1 %v1620_v34  ;;  %2341 = vmatpush3.bf16.msra.mxu0 %v1619_v43 }
 0x653   :  { %2342 = vmatprep.subr.bf16.mxu0 %v1620_v34 }
 0x656   :  { %2343 = vmatpush3.bf16.msra.mxu0 %v1620_v34 }
 0x716   :  { %v2330_v38 = vpop.f32.mrb[24].mxu1 }
 0x717   :  { %v1719_v1 = vpop.f32.mrb[25].mxu1 }
 0x718   :  { %1758 = vrot.lane.b32.xlu0 %v1719_v1, %s2611_s6  ;;  %v2331_v19 = vpop.f32.mrb[26].mxu1 }
 0x719   :  { %1764 = vrot.lane.b32.xlu1 %v2331_v19, %s2611_s6  ;;  %v1722_v26 = vpop.f32.mrb[27].mxu1 }
 0x71c   :  { %1762 = vrot.lane.b32.xlu0 %v2330_v38, %s2611_s6 }
 0x71d   :  { %1760 = vrot.lane.b32.xlu1 %v1722_v26, %s2611_s6 }
 0x721   :  { %1819 = vperm.xlu1 %2398, %v1722_v26  }
 0x725   :  { %1823 = vperm.xlu1 %2398, %v2330_v38   ;;  %v2334_v12 = vpop.f32.mrb[28].mxu1 }
 0x726   :  { %v1735_v9 = vpop.f32.mrb[29].mxu1 }
 0x727   :  { %1766 = vrot.lane.b32.xlu0 %v1735_v9, %s2611_s6  ;;  %v2335_v55 = vpop.f32.mrb[30].mxu1 }
 0x728   :  { %v1738_v6 = vpop.f32.mrb[31].mxu1 }
 0x729   :  { %1839 = vperm.xlu1 %2398, %v2334_v12  }
 0x72b   :  { %1770 = vrot.lane.b32.xlu0 %v2334_v12, %s2611_s6 }
 0x72d   :  { %1831 = vperm.xlu1 %2398, %v1735_v9  }
 0x72f   :  { %1815 = vperm.xlu0 %2397, %v1719_v1  }
 0x731   :  { %1772 = vrot.lane.b32.xlu1 %v2335_v55, %s2611_s6 }
 0x733   :  { %1827 = vperm.xlu0 %2397, %v2331_v19  }
 0x735   :  { %1768 = vrot.lane.b32.xlu1 %v1738_v6, %s2611_s6 }
 0x737   :  { %1843 = vperm.xlu0 %2397, %v2335_v55  }
 0x73b   :  { %1835 = vperm.xlu0 %2397, %v1738_v6  }
 0x78a   :  { %v1759_v2 = vpop.permute.xlu0 %1758 }
 0x78b   :  { %1782 = vxpose.xlu1.b32.start [1/8] (short) (narrow) %v1759_v2, 8  ;;  %v1765_v44 = vpop.permute.xlu1 %1764  ;;  %v2592_v2 = vld [vmem:[%s3455_s1] sm:$0xff] }
 0x78e   :  { %v1763_v39 = vpop.permute.xlu0 %1762 }
 0x78f   :  { %v1761_v53 = vpop.permute.xlu1 %1760 }
 0x790   :  { %1783 = vxpose.xlu1.b32.cont [2/8] (short) (narrow) %v1761_v53, 8 }
 0x794   :  { %1784 = vxpose.xlu1.b32.cont [3/8] (short) (narrow) %v1763_v39, 8 }
 0x798   :  { %1785 = vxpose.xlu1.b32.cont [4/8] (short) (narrow) %v1765_v44, 8 }
 0x799   :  { %v1767_v42 = vpop.permute.xlu0 %1766 }
 0x79c   :  { %1786 = vxpose.xlu1.b32.cont [5/8] (short) (narrow) %v1767_v42, 8 }
 0x79d   :  { %v1771_v59 = vpop.permute.xlu0 %1770 }
 0x7a0   :  { %v1820_v36 = vpop.permute.xlu1 %1819 }
 0x7a4   :  { %v1824_v56 = vpop.permute.xlu1 %1823 }
 0x7a8   :  { %v1840_v8 = vpop.permute.xlu1 %1839 }
 0x7ac   :  { %v1832_v46 = vpop.permute.xlu1 %1831 }
 0x7ae   :  { %v1816_v48 = vpop.permute.xlu0 %1815 }
 0x7b0   :  { %v1773_v30 = vpop.permute.xlu1 %1772 }
 0x7b2   :  { %v1828_v27 = vpop.permute.xlu0 %1827 }
 0x7b4   :  { %v1769_v11 = vpop.permute.xlu1 %1768 }
 0x7b5   :  { %1787 = vxpose.xlu1.b32.cont [6/8] (short) (narrow) %v1769_v11, 8 }
 0x7b6   :  { %v1844_v61 = vpop.permute.xlu0 %1843 }
 0x7b9   :  { %1788 = vxpose.xlu1.b32.cont [7/8] (short) (narrow) %v1771_v59, 8 }
 0x7ba   :  { %v1836_v35 = vpop.permute.xlu0 %1835 }
 0x7bd   :  { %1789 = vxpose.xlu1.b32.end [8/8] (short) (narrow) %v1773_v30, 8 }
 0x821   :  { %v1798_v25 = vpop.trf.xlu1 }
 0x822   :  { %v1849_v57 = vrot.slane %v1798_v25, %v348_v18 }
 0x824   :  { %v1850_v37 = vadd.f32 %v1849_v57, %v1816_v48  ;;  %v1851_v21 = vadd.f32 %v1849_v57, %v1820_v36  ;;  %v1852_v41 = vadd.f32 %v1849_v57, %v1824_v56  ;;  %v1853_v17 = vadd.f32 %v1849_v57, %v1828_v27 }
 0x825   :  { %v1854_v52 = vadd.f32 %v1849_v57, %v1832_v46  ;;  %v1855_v50 = vadd.f32 %v1849_v57, %v1836_v35  ;;  %v1856_v4 = vadd.f32 %v1849_v57, %v1840_v8  ;;  %v1857_v16 = vadd.f32 %v1849_v57, %v1844_v61  ;;  %v2593_v8 = vld [vmem:[%s3455_s1 + $0x8] sm:$0xff] }
 0x826   :  { %vm1858_vm1 = vcmp.gt.f32.partialorder %v1850_v37, 0.0  ;;  %v1866_v20 = vmul.f32 0.2, %v1850_v37  ;;  %v1867_v3 = vmul.f32 0.2, %v1851_v21  ;;  %vm1859_vm5 = vcmp.gt.f32.partialorder %v1851_v21, 0.0 }
 0x827   :  { %v1868_v23 = vmul.f32 0.2, %v1852_v41  ;;  %vm1860_vm6 = vcmp.gt.f32.partialorder %v1852_v41, 0.0  ;;  %v1869_v13 = vmul.f32 0.2, %v1853_v17  ;;  %vm1861_vm7 = vcmp.gt.f32.partialorder %v1853_v17, 0.0 }
 0x828   :  { %v1874_v47 = vsel %vm1858_vm1, %v1850_v37, %v1866_v20  ;;  %v1875_v51 = vsel %vm1859_vm5, %v1851_v21, %v1867_v3  ;;  %v1870_v5 = vmul.f32 0.2, %v1854_v52  ;;  %vm1862_vm8 = vcmp.gt.f32.partialorder %v1854_v52, 0.0  ;;  %v2594_v37 = vld [vmem:[%s3455_s1 + $0x10] sm:$0xff] }
 0x829   :  { %v1882_v29 = vsel %vm382_vm2, %v1874_v47, -inf  ;;  %v1885_v15 = vsel %vm382_vm2, %v1875_v51, -inf  ;;  %v1876_v18 = vsel %vm1860_vm6, %v1852_v41, %v1868_v23  ;;  %v1877_v7 = vsel %vm1861_vm7, %v1853_v17, %v1869_v13  ;;  %v2596_v13 = vld [vmem:[%s3455_s1 + $0x20] sm:$0xff] }
 0x82a   :  { %1883 = vmax.xlane.f32.xlu0 %v1882_v29  ;;  %v1888_v32 = vsel %vm382_vm2, %v1876_v18, -inf  ;;  %v1891_v28 = vsel %vm382_vm2, %v1877_v7, -inf  ;;  %v1878_v54 = vsel %vm1862_vm8, %v1854_v52, %v1870_v5  ;;  %v1871_v33 = vmul.f32 0.2, %v1855_v50  ;;  %v2595_v29 = vld [vmem:[%s3455_s1 + $0x18] sm:$0xff] }
 0x82b   :  { %vm1863_vm9 = vcmp.gt.f32.partialorder %v1855_v50, 0.0  ;;  %v1894_v58 = vsel %vm382_vm2, %v1878_v54, -inf  ;;  %v1872_v49 = vmul.f32 0.2, %v1856_v4  ;;  %vm1864_vm10 = vcmp.gt.f32.partialorder %v1856_v4, 0.0 }
 0x82c   :  { %v1879_v31 = vsel %vm1863_vm9, %v1855_v50, %v1871_v33  ;;  %v1873_v0 = vmul.f32 0.2, %v1857_v16  ;;  %vm1865_vm11 = vcmp.gt.f32.partialorder %v1857_v16, 0.0  ;;  %v2598_v33 = vld [vmem:[%s3455_s1 + $0x30] sm:$0xff] }
 0x82d   :  { %v1897_v14 = vsel %vm382_vm2, %v1879_v31, -inf  ;;  %v1880_v63 = vsel %vm1864_vm10, %v1856_v4, %v1872_v49  ;;  %v2599_v49 = vld [vmem:[%s3455_s1 + $0x38] sm:$0xff] }
 0x82e   :  { %1886 = vmax.xlane.f32.xlu0 %v1885_v15  ;;  %v1900_v40 = vsel %vm382_vm2, %v1880_v63, -inf  ;;  %v1881_v62 = vsel %vm1865_vm11, %v1857_v16, %v1873_v0 }
 0x82f   :  { %v1903_v45 = vsel %vm382_vm2, %v1881_v62, -inf }
 0x832   :  { %1889 = vmax.xlane.f32.xlu0 %v1888_v32 }
 0x836   :  { %1892 = vmax.xlane.f32.xlu0 %v1891_v28 }
 0x83a   :  { %1895 = vmax.xlane.f32.xlu0 %v1894_v58 }
 0x83e   :  { %1898 = vmax.xlane.f32.xlu0 %v1897_v14 }
 0x842   :  { %1901 = vmax.xlane.f32.xlu0 %v1900_v40 }
 0x846   :  { %1904 = vmax.xlane.f32.xlu0 %v1903_v45 }
 0x8b7   :  { %v1884_v24 = vpop.xlane.xlu0 %1883 }
 0x8b8   :  { %v1906_v10 = vsub.f32 %v1874_v47, %v1884_v24 }
 0x8ba   :  { %v1914_v22 = vmul.f32 1.442695, %v1906_v10 }
 0x8bb   :  { %v1887_v34 = vpop.xlane.xlu0 %1886 }
 0x8bc   :  { %2560 = vpow2.f32 %v1914_v22  ;;  %v1907_v60 = vsub.f32 %v1875_v51, %v1887_v34 }
 0x8be   :  { %v1916_v43 = vmul.f32 1.442695, %v1907_v60 }
 0x8bf   :  { %v1890_v38 = vpop.xlane.xlu0 %1889 }
 0x8c0   :  { %2562 = vpow2.f32 %v1916_v43  ;;  %v1908_v1 = vsub.f32 %v1876_v18, %v1890_v38  ;;  %v2144_v43 = vld [vmem:[%s3459_s7] ss:$0 sm:$0xff] }
 0x8c2   :  { %v1918_v19 = vmul.f32 1.442695, %v1908_v1 }
 0x8c3   :  { %v1893_v26 = vpop.xlane.xlu0 %1892 }
 0x8c4   :  { %2564 = vpow2.f32 %v1918_v19  ;;  %v1909_v12 = vsub.f32 %v1877_v7, %v1893_v26  ;;  %v2597_v7 = vld [vmem:[%s3455_s1 + $0x28] sm:$0xff] }
 0x8c6   :  { %v2561_v9 = vpop.eup %2560  ;;  %v1920_v55 = vmul.f32 1.442695, %v1909_v12 }
 0x8c7   :  { %v1896_v6 = vpop.xlane.xlu0 %1895  ;;  %v1930_v44 = vmul.f32 %v2592_v2, %v2561_v9 }
 0x8c8   :  { %2566 = vpow2.f32 %v1920_v55  ;;  %v1910_v53 = vsub.f32 %v1878_v54, %v1896_v6 }
 0x8c9   :  { %v1938_v39 = vsel %vm382_vm2, %v1930_v44, 0.0 }
 0x8ca   :  { %v2563_v42 = vpop.eup %2562  ;;  %v1922_v36 = vmul.f32 1.442695, %v1910_v53  ;;  %1939 = vadd.xlane.f32.xlu0 %v1938_v39 }
 0x8cb   :  { %v1899_v56 = vpop.xlane.xlu0 %1898  ;;  %v1931_v46 = vmul.f32 %v2593_v8, %v2563_v42 }
 0x8cc   :  { %2568 = vpow2.f32 %v1922_v36  ;;  %v1911_v30 = vsub.f32 %v1879_v31, %v1899_v56 }
 0x8cd   :  { %v1941_v11 = vsel %vm382_vm2, %v1931_v46, 0.0  ;;  %v1962_v59 = vpack.c.bf16 %v1931_v46, %v1930_v44 }
 0x8ce   :  { %v2565_v48 = vpop.eup %2564  ;;  %v1924_v25 = vmul.f32 1.442695, %v1911_v30  ;;  %1942 = vadd.xlane.f32.xlu0 %v1941_v11 }
 0x8cf   :  { %2344 = vmatprep.mubr.msk.bf16.mxu0 %vm382_vm2, %v1962_v59  ;;  %v1902_v57 = vpop.xlane.xlu0 %1901  ;;  %v1932_v21 = vmul.f32 %v2594_v37, %v2565_v48 }
 0x8d0   :  { %2570 = vpow2.f32 %v1924_v25  ;;  %v1912_v27 = vsub.f32 %v1880_v63, %v1902_v57 }
 0x8d1   :  { %v1944_v20 = vsel %vm382_vm2, %v1932_v21, 0.0 }
 0x8d2   :  { %v2567_v3 = vpop.eup %2566  ;;  %v1926_v41 = vmul.f32 1.442695, %v1912_v27  ;;  %1945 = vadd.xlane.f32.xlu1 %v1944_v20 }
 0x8d3   :  { %v1905_v47 = vpop.xlane.xlu0 %1904  ;;  %v1933_v51 = vmul.f32 %v2595_v29, %v2567_v3 }
 0x8d4   :  { %2572 = vpow2.f32 %v1926_v41  ;;  %v1913_v23 = vsub.f32 %v1881_v62, %v1905_v47 }
 0x8d5   :  { %v1947_v17 = vsel %vm382_vm2, %v1933_v51, 0.0  ;;  %v1963_v61 = vpack.c.bf16 %v1933_v51, %v1932_v21 }
 0x8d6   :  { %v2569_v15 = vpop.eup %2568  ;;  %v1928_v18 = vmul.f32 1.442695, %v1913_v23  ;;  %1948 = vadd.xlane.f32.xlu0 %v1947_v17 }
 0x8d7   :  { %2345 = vmatmul.mubr.msk.bf16.vlgmr.msra.gmra.mrb[32].mxu0 %vm382_vm2, %v1963_v61  ;;  %v1934_v52 = vmul.f32 %v2596_v13, %v2569_v15 }
 0x8d8   :  { %2574 = vpow2.f32 %v1928_v18 }
 0x8d9   :  { %v1950_v35 = vsel %vm382_vm2, %v1934_v52, 0.0 }
 0x8da   :  { %v2571_v32 = vpop.eup %2570  ;;  %1951 = vadd.xlane.f32.xlu0 %v1950_v35 }
 0x8db   :  { %v1935_v5 = vmul.f32 %v2597_v7, %v2571_v32 }
 0x8dd   :  { %v1953_v50 = vsel %vm382_vm2, %v1935_v5, 0.0  ;;  %v1964_v28 = vpack.c.bf16 %v1935_v5, %v1934_v52 }
 0x8de   :  { %v2573_v54 = vpop.eup %2572  ;;  %1954 = vadd.xlane.f32.xlu0 %v1953_v50 }
 0x8df   :  { %2348 = vmatprep.mubr.msk.bf16.mxu0 %vm382_vm2, %v1964_v28  ;;  %v1936_v4 = vmul.f32 %v2598_v33, %v2573_v54 }
 0x8e1   :  { %v1956_v58 = vsel %vm382_vm2, %v1936_v4, 0.0 }
 0x8e2   :  { %v2575_v31 = vpop.eup %2574  ;;  %1957 = vadd.xlane.f32.xlu0 %v1956_v58 }
 0x8e3   :  { %v1937_v16 = vmul.f32 %v2599_v49, %v2575_v31 }
 0x8e5   :  { %v1959_v14 = vsel %vm382_vm2, %v1937_v16, 0.0  ;;  %v1965_v63 = vpack.c.bf16 %v1937_v16, %v1936_v4 }
 0x8e6   :  { %1960 = vadd.xlane.f32.xlu0 %v1959_v14 }
 0x8e7   :  { %2349 = vmatmul.mubr.msk.bf16.gmra.mrb[36].mxu0 %vm382_vm2, %v1965_v63 }
 0x957   :  { %v1940_v0 = vpop.xlane.xlu0 %1939 }
 0x95b   :  { %v1943_v40 = vpop.xlane.xlu0 %1942 }
 0x95f   :  { %v1946_v45 = vpop.xlane.xlu1 %1945 }
 0x960   :  { %2576 = vrcp.f32 %v1946_v45 }
 0x961   :  { %2578 = vrcp.f32 %v1940_v0 }
 0x963   :  { %v1949_v62 = vpop.xlane.xlu0 %1948 }
 0x964   :  { %2580 = vrcp.f32 %v1949_v62 }
 0x965   :  { %2582 = vrcp.f32 %v1943_v40 }
 0x967   :  { %v1952_v24 = vpop.xlane.xlu0 %1951 }
 0x96a   :  { %v2577_v34 = vpop.eup %2576 }
 0x96b   :  { %v1955_v10 = vpop.xlane.xlu0 %1954  ;;  %v2579_v38 = vpop.eup %2578 }
 0x96e   :  { %v2581_v26 = vpop.eup %2580 }
 0x96f   :  { %v1958_v22 = vpop.xlane.xlu0 %1957  ;;  %v2583_v55 = vpop.eup %2582 }
 0x970   :  { %2584 = vrcp.f32 %v1958_v22 }
 0x971   :  { %2586 = vrcp.f32 %v1952_v24 }
 0x973   :  { %v1961_v42 = vpop.xlane.xlu0 %1960 }
 0x974   :  { %2588 = vrcp.f32 %v1961_v42 }
 0x975   :  { %2590 = vrcp.f32 %v1955_v10 }
 0x97a   :  { %v2585_v8 = vpop.eup %2584 }
 0x97b   :  { %v2587_v30 = vpop.eup %2586 }
 0x97e   :  { %v2589_v48 = vpop.eup %2588 }
 0x97f   :  { %v2591_v37 = vpop.eup %2590 }
 0x9aa   :  { %v2346_v60 = vpop.f32.mrb[32].mxu0 }
 0x9ab   :  { %v2053_v1 = vmul.f32 %v2577_v34, %v2346_v60  ;;  %v2012_v19 = vpop.f32.mrb[33].mxu0 }
 0x9ac   :  { %v2051_v12 = vmul.f32 %v2579_v38, %v2012_v19  ;;  %v2347_v9 = vpop.f32.mrb[34].mxu0 }
 0x9ad   :  { %v2068_v6 = vadd.f32 %v2144_v43, %v2053_v1  ;;  %v2054_v2 = vmul.f32 %v2581_v26, %v2347_v9  ;;  %v2015_v44 = vpop.f32.mrb[35].mxu0 }
 0x9ae   :  { %v2066_v53 = vadd.f32 %v2144_v43, %v2051_v12  ;;  %v2052_v39 = vmul.f32 %v2583_v55, %v2015_v44 }
 0x9af   :  { %2076 = vst [vmem:[%s3460_s8 + $0x10] sm:$0xff] %v2068_v6  ;;  %v2069_v36 = vadd.f32 %v2144_v43, %v2054_v2 }
 0x9b0   :  { %2074 = vst [vmem:[%s3460_s8] sm:$0xff] %v2066_v53  ;;  %v2067_v56 = vadd.f32 %v2144_v43, %v2052_v39 }
 0x9b1   :  { %2077 = vst [vmem:[%s3460_s8 + $0x18] sm:$0xff] %v2069_v36 }
 0x9b2   :  { %2075 = vst [vmem:[%s3460_s8 + $0x8] sm:$0xff] %v2067_v56 }
 0x9ba   :  { %v2350_v46 = vpop.f32.mrb[36].mxu0 }
 0x9bb   :  { %v2057_v11 = vmul.f32 %v2585_v8, %v2350_v46  ;;  %v2028_v59 = vpop.f32.mrb[37].mxu0 }
 0x9bc   :  { %v2055_v25 = vmul.f32 %v2587_v30, %v2028_v59  ;;  %v2351_v57 = vpop.f32.mrb[38].mxu0 }
 0x9bd   :  { %v2072_v21 = vadd.f32 %v2144_v43, %v2057_v11  ;;  %v2058_v27 = vmul.f32 %v2589_v48, %v2351_v57  ;;  %v2031_v20 = vpop.f32.mrb[39].mxu0 }
 0x9be   :  { %v2070_v3 = vadd.f32 %v2144_v43, %v2055_v25  ;;  %v2056_v41 = vmul.f32 %v2591_v37, %v2031_v20 }
 0x9bf   :  { %2080 = vst [vmem:[%s3460_s8 + $0x30] sm:$0xff] %v2072_v21  ;;  %v2073_v47 = vadd.f32 %v2144_v43, %v2058_v27 }
 0x9c0   :  { %2078 = vst [vmem:[%s3460_s8 + $0x20] sm:$0xff] %v2070_v3  ;;  %v2071_v29 = vadd.f32 %v2144_v43, %v2056_v41 }
 0x9c1   :  { %2081 = vst [vmem:[%s3460_s8 + $0x38] sm:$0xff] %v2073_v47 }
 0x9c2   :  { %2079 = vst [vmem:[%s3460_s8 + $0x28] sm:$0xff] %v2071_v29 }

</bundles_post_ra>
